<compile_context>
chip_gen: v5e
topology: v5e:2x2
jax: 0.10.0
libtpu: 0.0.40
codegen_flags: <defaults>
</compile_context>

<pallas_src>
import functools

import jax
import jax.numpy as jnp
import numpy as np
from jax.experimental import pallas as pl
from jax.experimental.pallas import tpu as pltpu


def _centered_dft_matrix(n: int) -> jnp.ndarray:
    """Matrix F_c s.t. F_c @ x == fftshift(fft(ifftshift(x), norm='ortho'))."""
    eye = jnp.eye(n, dtype=jnp.complex64)
    f = jnp.fft.ifftshift(eye, axes=0)
    f = jnp.fft.fft(f, axis=0, norm="ortho")
    f = jnp.fft.fftshift(f, axes=0)
    return f  # (n, n) complex64


def _pick_coil_block(nc: int, ny: int, nx: int, budget_bytes: int = 8 << 20) -> int:
    """Largest divisor of nc whose per-step working set fits the VMEM budget."""
    per_coil = ny * nx * 4 * 8           # ~8 live f32 (Ny,Nx) planes per coil
    max_blk = max(1, min(16, budget_bytes // per_coil))
    blk = 1
    for d in range(1, nc + 1):
        if nc % d == 0 and d <= max_blk:
            blk = d
    return blk


def _forward_kernel(img_re_ref, img_im_ref, sm_re_ref, sm_im_ref,
                    fy_re_ref, fy_im_ref, fxt_re_ref, fxt_im_ref,
                    k_re_ref, k_im_ref):
    nc_blk, ny, nx = sm_re_ref.shape

    a_re = img_re_ref[0]                      # (Ny, Nx)
    a_im = img_im_ref[0]
    b_re = sm_re_ref[...]                     # (NC_BLK, Ny, Nx)
    b_im = sm_im_ref[...]

    # complex coil images; coils stacked along the sublane (row) axis.
    c_re = (a_re[None] * b_re - a_im[None] * b_im).reshape(nc_blk * ny, nx)
    c_im = (a_re[None] * b_im + a_im[None] * b_re).reshape(nc_blk * ny, nx)

    # ---- stage A: centered DFT along x, whole coil block in one matmul set ----
    # Y = C @ FxT via Gauss 3-multiply complex product.
    fxt_re = fxt_re_ref[...]
    fxt_im = fxt_im_ref[...]
    fxt_sum = fxt_re + fxt_im
    t1 = jnp.dot(c_re, fxt_re, preferred_element_type=jnp.float32)
    t2 = jnp.dot(c_im, fxt_im, preferred_element_type=jnp.float32)
    t3 = jnp.dot(c_re + c_im, fxt_sum, preferred_element_type=jnp.float32)
    y_re = t1 - t2                            # (NC_BLK*Ny, Nx)
    y_im = t3 - t1 - t2

    # ---- stage B: centered DFT along y, per coil (static unroll, NC_BLK small) ----
    fy_re = fy_re_ref[...]
    fy_im = fy_im_ref[...]
    fy_sum = fy_re + fy_im
    for c in range(nc_blk):
        u_re = y_re[c * ny:(c + 1) * ny, :]
        u_im = y_im[c * ny:(c + 1) * ny, :]
        s1 = jnp.dot(fy_re, u_re, preferred_element_type=jnp.float32)
        s2 = jnp.dot(fy_im, u_im, preferred_element_type=jnp.float32)
        s3 = jnp.dot(fy_sum, u_re + u_im, preferred_element_type=jnp.float32)
        k_re_ref[0, c] = s1 - s2
        k_im_ref[0, c] = s3 - s1 - s2


@functools.partial(jax.jit, static_argnames=("aggressive_opts",))
def _forward_impl(img, smaps, mask, aggressive_opts=True):
    """img: (Ns,Ny,Nx,2) f32, smaps: (Nc,Ny,Nx,2) f32, mask: (Ns,Nl,Nr,3) i32.
    Returns kspace: (Ns, Nc, Nl, Nr, 2) f32."""
    Ns, Ny, Nx, _ = img.shape
    Nc = smaps.shape[0]
    Nl, Nr = mask.shape[1], mask.shape[2]

    img_re, img_im = img[..., 0], img[..., 1]        # (Ns, Ny, Nx)
    sm_re, sm_im = smaps[..., 0], smaps[..., 1]      # (Nc, Ny, Nx)

    fy = _centered_dft_matrix(Ny)                    # (Ny, Ny) complex
    fxt = _centered_dft_matrix(Nx).T                 # (Nx, Nx) complex, transposed
    fy_re = jnp.real(fy).astype(jnp.float32)
    fy_im = jnp.imag(fy).astype(jnp.float32)
    fxt_re = jnp.real(fxt).astype(jnp.float32)
    fxt_im = jnp.imag(fxt).astype(jnp.float32)

    nc_blk = _pick_coil_block(Nc, Ny, Nx)
    n_cb = Nc // nc_blk

    # Put the larger axis first so megacore (v7x) sharding always has >=2 units.
    if Ns >= n_cb:
        grid = (Ns, n_cb)
        s_of = lambda i, j: i
        c_of = lambda i, j: j
    else:
        grid = (n_cb, Ns)
        s_of = lambda i, j: j
        c_of = lambda i, j: i

    const_kw = dict(pipeline_mode=pl.Buffered(1)) if aggressive_opts else {}

    in_specs = [
        pl.BlockSpec((1, Ny, Nx), lambda i, j: (s_of(i, j), 0, 0)),       # img_re
        pl.BlockSpec((1, Ny, Nx), lambda i, j: (s_of(i, j), 0, 0)),       # img_im
        pl.BlockSpec((nc_blk, Ny, Nx), lambda i, j: (c_of(i, j), 0, 0)),  # sm_re
        pl.BlockSpec((nc_blk, Ny, Nx), lambda i, j: (c_of(i, j), 0, 0)),  # sm_im
        pl.BlockSpec((Ny, Ny), lambda i, j: (0, 0), **const_kw),          # Fy_re
        pl.BlockSpec((Ny, Ny), lambda i, j: (0, 0), **const_kw),          # Fy_im
        pl.BlockSpec((Nx, Nx), lambda i, j: (0, 0), **const_kw),          # FxT_re
        pl.BlockSpec((Nx, Nx), lambda i, j: (0, 0), **const_kw),          # FxT_im
    ]
    out_specs = [
        pl.BlockSpec((1, nc_blk, Ny, Nx),
                     lambda i, j: (s_of(i, j), c_of(i, j), 0, 0)),
        pl.BlockSpec((1, nc_blk, Ny, Nx),
                     lambda i, j: (s_of(i, j), c_of(i, j), 0, 0)),
    ]

    if aggressive_opts:
        compiler_params = pltpu.CompilerParams(
            dimension_semantics=("parallel", "parallel"),
            vmem_limit_bytes=48 * 1024 * 1024)
        flops = 6 * Ns * Nc * Ny * Nx * (Ny + Nx)     # 3 matmuls/stage, 2 flops/MAC
        bytes_accessed = 4 * (2 * Ns * Ny * Nx + 2 * Nc * Ny * Nx
                              + 2 * Ny * Ny + 2 * Nx * Nx
                              + 2 * Ns * Nc * Ny * Nx)
        call_kwargs = dict(cost_estimate=pl.CostEstimate(
            flops=int(flops), transcendentals=0,
            bytes_accessed=int(bytes_accessed)))
    else:
        compiler_params = pltpu.CompilerParams(
            dimension_semantics=("parallel", "parallel"))
        call_kwargs = {}

    k_re, k_im = pl.pallas_call(
        _forward_kernel,
        out_shape=(
            jax.ShapeDtypeStruct((Ns, Nc, Ny, Nx), jnp.float32),
            jax.ShapeDtypeStruct((Ns, Nc, Ny, Nx), jnp.float32),
        ),
        grid_spec=pltpu.PrefetchScalarGridSpec(
            num_scalar_prefetch=0,
            grid=grid,
            in_specs=in_specs,
            out_specs=out_specs,
        ),
        compiler_params=compiler_params,
        **call_kwargs,
    )(img_re, img_im, sm_re, sm_im, fy_re, fy_im, fxt_re, fxt_im)

    # ---- mask-driven k-space sampling (data-dependent gather; thin JAX glue) ----
    my = mask[..., 1].astype(jnp.int32)                   # (Ns, Nl, Nr)
    mx = mask[..., 2].astype(jnp.int32)
    lin = (my * Nx + mx).reshape(Ns, 1, Nl * Nr)          # (Ns, 1, Nl*Nr)
    flat_re = k_re.reshape(Ns, Nc, Ny * Nx)
    flat_im = k_im.reshape(Ns, Nc, Ny * Nx)
    g_re = jnp.take_along_axis(flat_re, lin, axis=2).reshape(Ns, Nc, Nl, Nr)
    g_im = jnp.take_along_axis(flat_im, lin, axis=2).reshape(Ns, Nc, Nl, Nr)
    return jnp.stack([g_re, g_im], axis=-1)               # (Ns, Nc, Nl, Nr, 2)


def forward_operator(img, smaps, mask):
    try:
        return _forward_impl(img, smaps, mask, aggressive_opts=True)
    except Exception:
        # Conservative fallback: same kernel, default buffering / params.
        return _forward_impl(img, smaps, mask, aggressive_opts=False)


def _reference(img, smaps, mask):
    """Pure-JAX reference mirroring the PyTorch module."""
    img_c = img[..., 0] + 1j * img[..., 1]                # (Ns, Ny, Nx)
    sm_c = smaps[..., 0] + 1j * smaps[..., 1]             # (Nc, Ny, Nx)
    prod = img_c[:, None, :, :] * sm_c[None, :, :, :]     # (Ns, Nc, Ny, Nx)
    ksp = jnp.fft.ifftshift(prod, axes=(-2, -1))
    ksp = jnp.fft.fft2(ksp, norm="ortho")
    ksp = jnp.fft.fftshift(ksp, axes=(-2, -1))
    Ns = img.shape[0]
    batch_idx = jnp.arange(Ns)[:, None, None]
    my = mask[..., 1]
    mx = mask[..., 2]
    g = ksp[batch_idx, :, my, mx]                         # (Ns, Nl, Nr, Nc)
    out = jnp.stack([jnp.real(g), jnp.imag(g)], axis=-1)  # (Ns, Nl, Nr, Nc, 2)
    return jnp.transpose(out, (0, 3, 1, 2, 4)).astype(jnp.float32)


if __name__ == "__main__":
    Ns, Nc, Ny, Nx = 2, 4, 16, 16
    Nl, Nr = 8, 16

    key = jax.random.PRNGKey(0)
    k_img, k_sm, k_my, k_mx = jax.random.split(key, 4)

    img = jax.random.normal(k_img, (Ns, Ny, Nx, 2), dtype=jnp.float32)
    smaps = jax.random.normal(k_sm, (Nc, Ny, Nx, 2), dtype=jnp.float32)
    # mask columns: (slice_idx [unused in 4D path], ky, kx)
    my = jax.random.randint(k_my, (Ns, Nl, Nr), 0, Ny, dtype=jnp.int32)
    mx = jax.random.randint(k_mx, (Ns, Nl, Nr), 0, Nx, dtype=jnp.int32)
    mask = jnp.stack([jnp.zeros_like(my), my, mx], axis=-1)   # (Ns, Nl, Nr, 3)

    out = jax.block_until_ready(forward_operator(img, smaps, mask))
    assert out.shape == (Ns, Nc, Nl, Nr, 2), out.shape

    ref = jax.block_until_ready(_reference(img, smaps, mask))
    np.testing.assert_allclose(np.asarray(out), np.asarray(ref),
                               rtol=1e-4, atol=1e-4)

    print("KERNEL_OK")
</pallas_src>

<mosaic_0001>
module attributes {stable_mosaic.version = 11 : i64} {
  func.func @_forward_kernel(%arg0: i32, %arg1: i32, %arg2: memref<1x16x16xf32, #tpu.memory_space<vmem>>, %arg3: memref<1x16x16xf32, #tpu.memory_space<vmem>>, %arg4: memref<4x16x16xf32, #tpu.memory_space<vmem>>, %arg5: memref<4x16x16xf32, #tpu.memory_space<vmem>>, %arg6: memref<16x16xf32, #tpu.memory_space<vmem>>, %arg7: memref<16x16xf32, #tpu.memory_space<vmem>>, %arg8: memref<16x16xf32, #tpu.memory_space<vmem>>, %arg9: memref<16x16xf32, #tpu.memory_space<vmem>>, %arg10: memref<1x4x16x16xf32, #tpu.memory_space<vmem>>, %arg11: memref<1x4x16x16xf32, #tpu.memory_space<vmem>>) attributes {dimension_semantics = [#tpu.dimension_semantics<parallel>, #tpu.dimension_semantics<parallel>], iteration_bounds = array<i64: 2, 1>, scalar_prefetch = 0 : i64, scratch_operands = 0 : i64, tpu.core_type = #tpu.core_type<tc>, window_params = [{transform_indices = @transform_0, window_bounds = array<i64: 1, 16, 16>}, {transform_indices = @transform_1, window_bounds = array<i64: 1, 16, 16>}, {transform_indices = @transform_2, window_bounds = array<i64: 4, 16, 16>}, {transform_indices = @transform_3, window_bounds = array<i64: 4, 16, 16>}, {pipeline_mode = #tpu.pipeline_mode<synchronous>, transform_indices = @transform_4, window_bounds = array<i64: 16, 16>}, {pipeline_mode = #tpu.pipeline_mode<synchronous>, transform_indices = @transform_5, window_bounds = array<i64: 16, 16>}, {pipeline_mode = #tpu.pipeline_mode<synchronous>, transform_indices = @transform_6, window_bounds = array<i64: 16, 16>}, {pipeline_mode = #tpu.pipeline_mode<synchronous>, transform_indices = @transform_7, window_bounds = array<i64: 16, 16>}, {transform_indices = @transform_8, window_bounds = array<i64: 1, 4, 16, 16>}, {transform_indices = @transform_9, window_bounds = array<i64: 1, 4, 16, 16>}]} {
    %c0 = arith.constant 0 : index
    %c0_0 = arith.constant 0 : index
    %c0_1 = arith.constant 0 : index
    %0 = vector.load %arg2[%c0, %c0_0, %c0_1] : memref<1x16x16xf32, #tpu.memory_space<vmem>>, vector<1x16x16xf32>
    %1 = vector.shape_cast %0 : vector<1x16x16xf32> to vector<16x16xf32>
    %c0_2 = arith.constant 0 : index
    %c0_3 = arith.constant 0 : index
    %c0_4 = arith.constant 0 : index
    %2 = vector.load %arg3[%c0_2, %c0_3, %c0_4] : memref<1x16x16xf32, #tpu.memory_space<vmem>>, vector<1x16x16xf32>
    %3 = vector.shape_cast %2 : vector<1x16x16xf32> to vector<16x16xf32>
    %c0_5 = arith.constant 0 : index
    %c0_6 = arith.constant 0 : index
    %c0_7 = arith.constant 0 : index
    %4 = vector.load %arg4[%c0_5, %c0_6, %c0_7] : memref<4x16x16xf32, #tpu.memory_space<vmem>>, vector<4x16x16xf32>
    %c0_8 = arith.constant 0 : index
    %c0_9 = arith.constant 0 : index
    %c0_10 = arith.constant 0 : index
    %5 = vector.load %arg5[%c0_8, %c0_9, %c0_10] : memref<4x16x16xf32, #tpu.memory_space<vmem>>, vector<4x16x16xf32>
    %6 = vector.shape_cast %1 : vector<16x16xf32> to vector<1x16x16xf32>
    %7 = vector.broadcast %6 : vector<1x16x16xf32> to vector<4x16x16xf32>
    %8 = arith.mulf %7, %4 : vector<4x16x16xf32>
    %9 = vector.shape_cast %3 : vector<16x16xf32> to vector<1x16x16xf32>
    %10 = vector.broadcast %9 : vector<1x16x16xf32> to vector<4x16x16xf32>
    %11 = arith.mulf %10, %5 : vector<4x16x16xf32>
    %12 = arith.subf %8, %11 : vector<4x16x16xf32>
    %13 = vector.shape_cast %12 : vector<4x16x16xf32> to vector<64x16xf32>
    %14 = vector.shape_cast %1 : vector<16x16xf32> to vector<1x16x16xf32>
    %15 = vector.broadcast %14 : vector<1x16x16xf32> to vector<4x16x16xf32>
    %16 = arith.mulf %15, %5 : vector<4x16x16xf32>
    %17 = vector.shape_cast %3 : vector<16x16xf32> to vector<1x16x16xf32>
    %18 = vector.broadcast %17 : vector<1x16x16xf32> to vector<4x16x16xf32>
    %19 = arith.mulf %18, %4 : vector<4x16x16xf32>
    %20 = arith.addf %16, %19 : vector<4x16x16xf32>
    %21 = vector.shape_cast %20 : vector<4x16x16xf32> to vector<64x16xf32>
    %c0_11 = arith.constant 0 : index
    %c0_12 = arith.constant 0 : index
    %22 = vector.load %arg8[%c0_11, %c0_12] : memref<16x16xf32, #tpu.memory_space<vmem>>, vector<16x16xf32>
    %c0_13 = arith.constant 0 : index
    %c0_14 = arith.constant 0 : index
    %23 = vector.load %arg9[%c0_13, %c0_14] : memref<16x16xf32, #tpu.memory_space<vmem>>, vector<16x16xf32>
    %24 = arith.addf %22, %23 : vector<16x16xf32>
    %cst = arith.constant dense<0.000000e+00> : vector<64x16xf32>
    %25 = tpu.matmul %13, %22, %cst {dimension_numbers = #tpu.dot_dimension_numbers<[1], [0], [0], [1], [0, 0, 1, 1], [], []>} : vector<64x16xf32>, vector<16x16xf32>, vector<64x16xf32> -> vector<64x16xf32>
    %cst_15 = arith.constant dense<0.000000e+00> : vector<64x16xf32>
    %26 = tpu.matmul %21, %23, %cst_15 {dimension_numbers = #tpu.dot_dimension_numbers<[1], [0], [0], [1], [0, 0, 1, 1], [], []>} : vector<64x16xf32>, vector<16x16xf32>, vector<64x16xf32> -> vector<64x16xf32>
    %27 = arith.addf %13, %21 : vector<64x16xf32>
    %cst_16 = arith.constant dense<0.000000e+00> : vector<64x16xf32>
    %28 = tpu.matmul %27, %24, %cst_16 {dimension_numbers = #tpu.dot_dimension_numbers<[1], [0], [0], [1], [0, 0, 1, 1], [], []>} : vector<64x16xf32>, vector<16x16xf32>, vector<64x16xf32> -> vector<64x16xf32>
    %29 = arith.subf %25, %26 : vector<64x16xf32>
    %30 = arith.subf %28, %25 : vector<64x16xf32>
    %31 = arith.subf %30, %26 : vector<64x16xf32>
    %c0_17 = arith.constant 0 : index
    %c0_18 = arith.constant 0 : index
    %32 = vector.load %arg6[%c0_17, %c0_18] : memref<16x16xf32, #tpu.memory_space<vmem>>, vector<16x16xf32>
    %c0_19 = arith.constant 0 : index
    %c0_20 = arith.constant 0 : index
    %33 = vector.load %arg7[%c0_19, %c0_20] : memref<16x16xf32, #tpu.memory_space<vmem>>, vector<16x16xf32>
    %34 = arith.addf %32, %33 : vector<16x16xf32>
    %35 = vector.extract_strided_slice %29 {offsets = [0, 0], sizes = [16, 16], strides = [1, 1]} : vector<64x16xf32> to vector<16x16xf32>
    %36 = vector.extract_strided_slice %31 {offsets = [0, 0], sizes = [16, 16], strides = [1, 1]} : vector<64x16xf32> to vector<16x16xf32>
    %cst_21 = arith.constant dense<0.000000e+00> : vector<16x16xf32>
    %37 = tpu.matmul %32, %35, %cst_21 {dimension_numbers = #tpu.dot_dimension_numbers<[1], [0], [0], [1], [0, 0, 1, 1], [], []>} : vector<16x16xf32>, vector<16x16xf32>, vector<16x16xf32> -> vector<16x16xf32>
    %cst_22 = arith.constant dense<0.000000e+00> : vector<16x16xf32>
    %38 = tpu.matmul %33, %36, %cst_22 {dimension_numbers = #tpu.dot_dimension_numbers<[1], [0], [0], [1], [0, 0, 1, 1], [], []>} : vector<16x16xf32>, vector<16x16xf32>, vector<16x16xf32> -> vector<16x16xf32>
    %39 = arith.addf %35, %36 : vector<16x16xf32>
    %cst_23 = arith.constant dense<0.000000e+00> : vector<16x16xf32>
    %40 = tpu.matmul %34, %39, %cst_23 {dimension_numbers = #tpu.dot_dimension_numbers<[1], [0], [0], [1], [0, 0, 1, 1], [], []>} : vector<16x16xf32>, vector<16x16xf32>, vector<16x16xf32> -> vector<16x16xf32>
    %41 = arith.subf %37, %38 : vector<16x16xf32>
    %c0_24 = arith.constant 0 : index
    %c0_25 = arith.constant 0 : index
    %c0_26 = arith.constant 0 : index
    %c0_27 = arith.constant 0 : index
    %42 = vector.load %arg10[%c0_24, %c0_25, %c0_26, %c0_27] : memref<1x4x16x16xf32, #tpu.memory_space<vmem>>, vector<1x1x16x16xf32>
    %43 = vector.shape_cast %42 : vector<1x1x16x16xf32> to vector<16x16xf32>
    %44 = vector.shape_cast %41 : vector<16x16xf32> to vector<1x1x16x16xf32>
    tpu.vector_store %arg10[%c0_24, %c0_25, %c0_26, %c0_27], %44 {strides = array<i32>} : memref<1x4x16x16xf32, #tpu.memory_space<vmem>>, vector<1x1x16x16xf32>,
    %45 = arith.subf %40, %37 : vector<16x16xf32>
    %46 = arith.subf %45, %38 : vector<16x16xf32>
    %c0_28 = arith.constant 0 : index
    %c0_29 = arith.constant 0 : index
    %c0_30 = arith.constant 0 : index
    %c0_31 = arith.constant 0 : index
    %47 = vector.load %arg11[%c0_28, %c0_29, %c0_30, %c0_31] : memref<1x4x16x16xf32, #tpu.memory_space<vmem>>, vector<1x1x16x16xf32>
    %48 = vector.shape_cast %47 : vector<1x1x16x16xf32> to vector<16x16xf32>
    %49 = vector.shape_cast %46 : vector<16x16xf32> to vector<1x1x16x16xf32>
    tpu.vector_store %arg11[%c0_28, %c0_29, %c0_30, %c0_31], %49 {strides = array<i32>} : memref<1x4x16x16xf32, #tpu.memory_space<vmem>>, vector<1x1x16x16xf32>,
    %50 = vector.extract_strided_slice %29 {offsets = [16, 0], sizes = [16, 16], strides = [1, 1]} : vector<64x16xf32> to vector<16x16xf32>
    %51 = vector.extract_strided_slice %31 {offsets = [16, 0], sizes = [16, 16], strides = [1, 1]} : vector<64x16xf32> to vector<16x16xf32>
    %cst_32 = arith.constant dense<0.000000e+00> : vector<16x16xf32>
    %52 = tpu.matmul %32, %50, %cst_32 {dimension_numbers = #tpu.dot_dimension_numbers<[1], [0], [0], [1], [0, 0, 1, 1], [], []>} : vector<16x16xf32>, vector<16x16xf32>, vector<16x16xf32> -> vector<16x16xf32>
    %cst_33 = arith.constant dense<0.000000e+00> : vector<16x16xf32>
    %53 = tpu.matmul %33, %51, %cst_33 {dimension_numbers = #tpu.dot_dimension_numbers<[1], [0], [0], [1], [0, 0, 1, 1], [], []>} : vector<16x16xf32>, vector<16x16xf32>, vector<16x16xf32> -> vector<16x16xf32>
    %54 = arith.addf %50, %51 : vector<16x16xf32>
    %cst_34 = arith.constant dense<0.000000e+00> : vector<16x16xf32>
    %55 = tpu.matmul %34, %54, %cst_34 {dimension_numbers = #tpu.dot_dimension_numbers<[1], [0], [0], [1], [0, 0, 1, 1], [], []>} : vector<16x16xf32>, vector<16x16xf32>, vector<16x16xf32> -> vector<16x16xf32>
    %56 = arith.subf %52, %53 : vector<16x16xf32>
    %c0_35 = arith.constant 0 : index
    %c1 = arith.constant 1 : index
    %c0_36 = arith.constant 0 : index
    %c0_37 = arith.constant 0 : index
    %57 = vector.load %arg10[%c0_35, %c1, %c0_36, %c0_37] : memref<1x4x16x16xf32, #tpu.memory_space<vmem>>, vector<1x1x16x16xf32>
    %58 = vector.shape_cast %57 : vector<1x1x16x16xf32> to vector<16x16xf32>
    %59 = vector.shape_cast %56 : vector<16x16xf32> to vector<1x1x16x16xf32>
    tpu.vector_store %arg10[%c0_35, %c1, %c0_36, %c0_37], %59 {strides = array<i32>} : memref<1x4x16x16xf32, #tpu.memory_space<vmem>>, vector<1x1x16x16xf32>,
    %60 = arith.subf %55, %52 : vector<16x16xf32>
    %61 = arith.subf %60, %53 : vector<16x16xf32>
    %c0_38 = arith.constant 0 : index
    %c1_39 = arith.constant 1 : index
    %c0_40 = arith.constant 0 : index
    %c0_41 = arith.constant 0 : index
    %62 = vector.load %arg11[%c0_38, %c1_39, %c0_40, %c0_41] : memref<1x4x16x16xf32, #tpu.memory_space<vmem>>, vector<1x1x16x16xf32>
    %63 = vector.shape_cast %62 : vector<1x1x16x16xf32> to vector<16x16xf32>
    %64 = vector.shape_cast %61 : vector<16x16xf32> to vector<1x1x16x16xf32>
    tpu.vector_store %arg11[%c0_38, %c1_39, %c0_40, %c0_41], %64 {strides = array<i32>} : memref<1x4x16x16xf32, #tpu.memory_space<vmem>>, vector<1x1x16x16xf32>,
    %65 = vector.extract_strided_slice %29 {offsets = [32, 0], sizes = [16, 16], strides = [1, 1]} : vector<64x16xf32> to vector<16x16xf32>
    %66 = vector.extract_strided_slice %31 {offsets = [32, 0], sizes = [16, 16], strides = [1, 1]} : vector<64x16xf32> to vector<16x16xf32>
    %cst_42 = arith.constant dense<0.000000e+00> : vector<16x16xf32>
    %67 = tpu.matmul %32, %65, %cst_42 {dimension_numbers = #tpu.dot_dimension_numbers<[1], [0], [0], [1], [0, 0, 1, 1], [], []>} : vector<16x16xf32>, vector<16x16xf32>, vector<16x16xf32> -> vector<16x16xf32>
    %cst_43 = arith.constant dense<0.000000e+00> : vector<16x16xf32>
    %68 = tpu.matmul %33, %66, %cst_43 {dimension_numbers = #tpu.dot_dimension_numbers<[1], [0], [0], [1], [0, 0, 1, 1], [], []>} : vector<16x16xf32>, vector<16x16xf32>, vector<16x16xf32> -> vector<16x16xf32>
    %69 = arith.addf %65, %66 : vector<16x16xf32>
    %cst_44 = arith.constant dense<0.000000e+00> : vector<16x16xf32>
    %70 = tpu.matmul %34, %69, %cst_44 {dimension_numbers = #tpu.dot_dimension_numbers<[1], [0], [0], [1], [0, 0, 1, 1], [], []>} : vector<16x16xf32>, vector<16x16xf32>, vector<16x16xf32> -> vector<16x16xf32>
    %71 = arith.subf %67, %68 : vector<16x16xf32>
    %c0_45 = arith.constant 0 : index
    %c2 = arith.constant 2 : index
    %c0_46 = arith.constant 0 : index
    %c0_47 = arith.constant 0 : index
    %72 = vector.load %arg10[%c0_45, %c2, %c0_46, %c0_47] : memref<1x4x16x16xf32, #tpu.memory_space<vmem>>, vector<1x1x16x16xf32>
    %73 = vector.shape_cast %72 : vector<1x1x16x16xf32> to vector<16x16xf32>
    %74 = vector.shape_cast %71 : vector<16x16xf32> to vector<1x1x16x16xf32>
    tpu.vector_store %arg10[%c0_45, %c2, %c0_46, %c0_47], %74 {strides = array<i32>} : memref<1x4x16x16xf32, #tpu.memory_space<vmem>>, vector<1x1x16x16xf32>,
    %75 = arith.subf %70, %67 : vector<16x16xf32>
    %76 = arith.subf %75, %68 : vector<16x16xf32>
    %c0_48 = arith.constant 0 : index
    %c2_49 = arith.constant 2 : index
    %c0_50 = arith.constant 0 : index
    %c0_51 = arith.constant 0 : index
    %77 = vector.load %arg11[%c0_48, %c2_49, %c0_50, %c0_51] : memref<1x4x16x16xf32, #tpu.memory_space<vmem>>, vector<1x1x16x16xf32>
    %78 = vector.shape_cast %77 : vector<1x1x16x16xf32> to vector<16x16xf32>
    %79 = vector.shape_cast %76 : vector<16x16xf32> to vector<1x1x16x16xf32>
    tpu.vector_store %arg11[%c0_48, %c2_49, %c0_50, %c0_51], %79 {strides = array<i32>} : memref<1x4x16x16xf32, #tpu.memory_space<vmem>>, vector<1x1x16x16xf32>,
    %80 = vector.extract_strided_slice %29 {offsets = [48, 0], sizes = [16, 16], strides = [1, 1]} : vector<64x16xf32> to vector<16x16xf32>
    %81 = vector.extract_strided_slice %31 {offsets = [48, 0], sizes = [16, 16], strides = [1, 1]} : vector<64x16xf32> to vector<16x16xf32>
    %cst_52 = arith.constant dense<0.000000e+00> : vector<16x16xf32>
    %82 = tpu.matmul %32, %80, %cst_52 {dimension_numbers = #tpu.dot_dimension_numbers<[1], [0], [0], [1], [0, 0, 1, 1], [], []>} : vector<16x16xf32>, vector<16x16xf32>, vector<16x16xf32> -> vector<16x16xf32>
    %cst_53 = arith.constant dense<0.000000e+00> : vector<16x16xf32>
    %83 = tpu.matmul %33, %81, %cst_53 {dimension_numbers = #tpu.dot_dimension_numbers<[1], [0], [0], [1], [0, 0, 1, 1], [], []>} : vector<16x16xf32>, vector<16x16xf32>, vector<16x16xf32> -> vector<16x16xf32>
    %84 = arith.addf %80, %81 : vector<16x16xf32>
    %cst_54 = arith.constant dense<0.000000e+00> : vector<16x16xf32>
    %85 = tpu.matmul %34, %84, %cst_54 {dimension_numbers = #tpu.dot_dimension_numbers<[1], [0], [0], [1], [0, 0, 1, 1], [], []>} : vector<16x16xf32>, vector<16x16xf32>, vector<16x16xf32> -> vector<16x16xf32>
    %86 = arith.subf %82, %83 : vector<16x16xf32>
    %c0_55 = arith.constant 0 : index
    %c3 = arith.constant 3 : index
    %c0_56 = arith.constant 0 : index
    %c0_57 = arith.constant 0 : index
    %87 = vector.load %arg10[%c0_55, %c3, %c0_56, %c0_57] : memref<1x4x16x16xf32, #tpu.memory_space<vmem>>, vector<1x1x16x16xf32>
    %88 = vector.shape_cast %87 : vector<1x1x16x16xf32> to vector<16x16xf32>
    %89 = vector.shape_cast %86 : vector<16x16xf32> to vector<1x1x16x16xf32>
    tpu.vector_store %arg10[%c0_55, %c3, %c0_56, %c0_57], %89 {strides = array<i32>} : memref<1x4x16x16xf32, #tpu.memory_space<vmem>>, vector<1x1x16x16xf32>,
    %90 = arith.subf %85, %82 : vector<16x16xf32>
    %91 = arith.subf %90, %83 : vector<16x16xf32>
    %c0_58 = arith.constant 0 : index
    %c3_59 = arith.constant 3 : index
    %c0_60 = arith.constant 0 : index
    %c0_61 = arith.constant 0 : index
    %92 = vector.load %arg11[%c0_58, %c3_59, %c0_60, %c0_61] : memref<1x4x16x16xf32, #tpu.memory_space<vmem>>, vector<1x1x16x16xf32>
    %93 = vector.shape_cast %92 : vector<1x1x16x16xf32> to vector<16x16xf32>
    %94 = vector.shape_cast %91 : vector<16x16xf32> to vector<1x1x16x16xf32>
    tpu.vector_store %arg11[%c0_58, %c3_59, %c0_60, %c0_61], %94 {strides = array<i32>} : memref<1x4x16x16xf32, #tpu.memory_space<vmem>>, vector<1x1x16x16xf32>,
    return
  }
  func.func @transform_0(%arg0: i32, %arg1: i32) -> (i32, i32, i32) {
    %c0_i32 = arith.constant 0 : i32
    %c0_i32_0 = arith.constant 0 : i32
    %c0_i32_1 = arith.constant 0 : i32
    return %arg0, %c0_i32, %c0_i32_0 : i32, i32, i32
  }
  func.func @transform_1(%arg0: i32, %arg1: i32) -> (i32, i32, i32) {
    %c0_i32 = arith.constant 0 : i32
    %c0_i32_0 = arith.constant 0 : i32
    %c0_i32_1 = arith.constant 0 : i32
    return %arg0, %c0_i32, %c0_i32_0 : i32, i32, i32
  }
  func.func @transform_2(%arg0: i32, %arg1: i32) -> (i32, i32, i32) {
    %c0_i32 = arith.constant 0 : i32
    %c0_i32_0 = arith.constant 0 : i32
    %c0_i32_1 = arith.constant 0 : i32
    return %arg1, %c0_i32, %c0_i32_0 : i32, i32, i32
  }
  func.func @transform_3(%arg0: i32, %arg1: i32) -> (i32, i32, i32) {
    %c0_i32 = arith.constant 0 : i32
    %c0_i32_0 = arith.constant 0 : i32
    %c0_i32_1 = arith.constant 0 : i32
    return %arg1, %c0_i32, %c0_i32_0 : i32, i32, i32
  }
  func.func @transform_4(%arg0: i32, %arg1: i32) -> (i32, i32) {
    %c0_i32 = arith.constant 0 : i32
    %c0_i32_0 = arith.constant 0 : i32
    %c0_i32_1 = arith.constant 0 : i32
    return %c0_i32, %c0_i32_0 : i32, i32
  }
  func.func @transform_5(%arg0: i32, %arg1: i32) -> (i32, i32) {
    %c0_i32 = arith.constant 0 : i32
    %c0_i32_0 = arith.constant 0 : i32
    %c0_i32_1 = arith.constant 0 : i32
    return %c0_i32, %c0_i32_0 : i32, i32
  }
  func.func @transform_6(%arg0: i32, %arg1: i32) -> (i32, i32) {
    %c0_i32 = arith.constant 0 : i32
    %c0_i32_0 = arith.constant 0 : i32
    %c0_i32_1 = arith.constant 0 : i32
    return %c0_i32, %c0_i32_0 : i32, i32
  }
  func.func @transform_7(%arg0: i32, %arg1: i32) -> (i32, i32) {
    %c0_i32 = arith.constant 0 : i32
    %c0_i32_0 = arith.constant 0 : i32
    %c0_i32_1 = arith.constant 0 : i32
    return %c0_i32, %c0_i32_0 : i32, i32
  }
  func.func @transform_8(%arg0: i32, %arg1: i32) -> (i32, i32, i32, i32) {
    %c0_i32 = arith.constant 0 : i32
    %c0_i32_0 = arith.constant 0 : i32
    %c0_i32_1 = arith.constant 0 : i32
    return %arg0, %arg1, %c0_i32, %c0_i32_0 : i32, i32, i32, i32
  }
  func.func @transform_9(%arg0: i32, %arg1: i32) -> (i32, i32, i32, i32) {
    %c0_i32 = arith.constant 0 : i32
    %c0_i32_0 = arith.constant 0 : i32
    %c0_i32_1 = arith.constant 0 : i32
    return %arg0, %arg1, %c0_i32, %c0_i32_0 : i32, i32, i32, i32
  }
}

module attributes {stable_mosaic.version = 11 : i64} {
  func.func @_forward_kernel(%arg0: i32, %arg1: i32, %arg2: memref<1x16x16xf32, #tpu.memory_space<vmem>>, %arg3: memref<1x16x16xf32, #tpu.memory_space<vmem>>, %arg4: memref<4x16x16xf32, #tpu.memory_space<vmem>>, %arg5: memref<4x16x16xf32, #tpu.memory_space<vmem>>, %arg6: memref<16x16xf32, #tpu.memory_space<vmem>>, %arg7: memref<16x16xf32, #tpu.memory_space<vmem>>, %arg8: memref<16x16xf32, #tpu.memory_space<vmem>>, %arg9: memref<16x16xf32, #tpu.memory_space<vmem>>, %arg10: memref<1x4x16x16xf32, #tpu.memory_space<vmem>>, %arg11: memref<1x4x16x16xf32, #tpu.memory_space<vmem>>) attributes {dimension_semantics = [#tpu.dimension_semantics<parallel>, #tpu.dimension_semantics<parallel>], iteration_bounds = array<i64: 2, 1>, scalar_prefetch = 0 : i64, scratch_operands = 0 : i64, tpu.core_type = #tpu.core_type<tc>, window_params = [{transform_indices = @transform_0, window_bounds = array<i64: 1, 16, 16>}, {transform_indices = @transform_1, window_bounds = array<i64: 1, 16, 16>}, {transform_indices = @transform_2, window_bounds = array<i64: 4, 16, 16>}, {transform_indices = @transform_3, window_bounds = array<i64: 4, 16, 16>}, {pipeline_mode = #tpu.pipeline_mode<synchronous>, transform_indices = @transform_4, window_bounds = array<i64: 16, 16>}, {pipeline_mode = #tpu.pipeline_mode<synchronous>, transform_indices = @transform_5, window_bounds = array<i64: 16, 16>}, {pipeline_mode = #tpu.pipeline_mode<synchronous>, transform_indices = @transform_6, window_bounds = array<i64: 16, 16>}, {pipeline_mode = #tpu.pipeline_mode<synchronous>, transform_indices = @transform_7, window_bounds = array<i64: 16, 16>}, {transform_indices = @transform_8, window_bounds = array<i64: 1, 4, 16, 16>}, {transform_indices = @transform_9, window_bounds = array<i64: 1, 4, 16, 16>}]} {
    %c0 = arith.constant 0 : index
    %c0_0 = arith.constant 0 : index
    %c0_1 = arith.constant 0 : index
    %0 = vector.load %arg2[%c0, %c0_0, %c0_1] : memref<1x16x16xf32, #tpu.memory_space<vmem>>, vector<1x16x16xf32>
    %1 = vector.shape_cast %0 : vector<1x16x16xf32> to vector<16x16xf32>
    %c0_2 = arith.constant 0 : index
    %c0_3 = arith.constant 0 : index
    %c0_4 = arith.constant 0 : index
    %2 = vector.load %arg3[%c0_2, %c0_3, %c0_4] : memref<1x16x16xf32, #tpu.memory_space<vmem>>, vector<1x16x16xf32>
    %3 = vector.shape_cast %2 : vector<1x16x16xf32> to vector<16x16xf32>
    %c0_5 = arith.constant 0 : index
    %c0_6 = arith.constant 0 : index
    %c0_7 = arith.constant 0 : index
    %4 = vector.load %arg4[%c0_5, %c0_6, %c0_7] : memref<4x16x16xf32, #tpu.memory_space<vmem>>, vector<4x16x16xf32>
    %c0_8 = arith.constant 0 : index
    %c0_9 = arith.constant 0 : index
    %c0_10 = arith.constant 0 : index
    %5 = vector.load %arg5[%c0_8, %c0_9, %c0_10] : memref<4x16x16xf32, #tpu.memory_space<vmem>>, vector<4x16x16xf32>
    %6 = vector.shape_cast %1 : vector<16x16xf32> to vector<1x16x16xf32>
    %7 = vector.broadcast %6 : vector<1x16x16xf32> to vector<4x16x16xf32>
    %8 = arith.mulf %7, %4 : vector<4x16x16xf32>
    %9 = vector.shape_cast %3 : vector<16x16xf32> to vector<1x16x16xf32>
    %10 = vector.broadcast %9 : vector<1x16x16xf32> to vector<4x16x16xf32>
    %11 = arith.mulf %10, %5 : vector<4x16x16xf32>
    %12 = arith.subf %8, %11 : vector<4x16x16xf32>
    %13 = vector.shape_cast %12 : vector<4x16x16xf32> to vector<64x16xf32>
    %14 = vector.shape_cast %1 : vector<16x16xf32> to vector<1x16x16xf32>
    %15 = vector.broadcast %14 : vector<1x16x16xf32> to vector<4x16x16xf32>
    %16 = arith.mulf %15, %5 : vector<4x16x16xf32>
    %17 = vector.shape_cast %3 : vector<16x16xf32> to vector<1x16x16xf32>
    %18 = vector.broadcast %17 : vector<1x16x16xf32> to vector<4x16x16xf32>
    %19 = arith.mulf %18, %4 : vector<4x16x16xf32>
    %20 = arith.addf %16, %19 : vector<4x16x16xf32>
    %21 = vector.shape_cast %20 : vector<4x16x16xf32> to vector<64x16xf32>
    %c0_11 = arith.constant 0 : index
    %c0_12 = arith.constant 0 : index
    %22 = vector.load %arg8[%c0_11, %c0_12] : memref<16x16xf32, #tpu.memory_space<vmem>>, vector<16x16xf32>
    %c0_13 = arith.constant 0 : index
    %c0_14 = arith.constant 0 : index
    %23 = vector.load %arg9[%c0_13, %c0_14] : memref<16x16xf32, #tpu.memory_space<vmem>>, vector<16x16xf32>
    %24 = arith.addf %22, %23 : vector<16x16xf32>
    %cst = arith.constant dense<0.000000e+00> : vector<64x16xf32>
    %25 = tpu.matmul %13, %22, %cst {dimension_numbers = #tpu.dot_dimension_numbers<[1], [0], [0], [1], [0, 0, 1, 1], [], []>} : vector<64x16xf32>, vector<16x16xf32>, vector<64x16xf32> -> vector<64x16xf32>
    %cst_15 = arith.constant dense<0.000000e+00> : vector<64x16xf32>
    %26 = tpu.matmul %21, %23, %cst_15 {dimension_numbers = #tpu.dot_dimension_numbers<[1], [0], [0], [1], [0, 0, 1, 1], [], []>} : vector<64x16xf32>, vector<16x16xf32>, vector<64x16xf32> -> vector<64x16xf32>
    %27 = arith.addf %13, %21 : vector<64x16xf32>
    %cst_16 = arith.constant dense<0.000000e+00> : vector<64x16xf32>
    %28 = tpu.matmul %27, %24, %cst_16 {dimension_numbers = #tpu.dot_dimension_numbers<[1], [0], [0], [1], [0, 0, 1, 1], [], []>} : vector<64x16xf32>, vector<16x16xf32>, vector<64x16xf32> -> vector<64x16xf32>
    %29 = arith.subf %25, %26 : vector<64x16xf32>
    %30 = arith.subf %28, %25 : vector<64x16xf32>
    %31 = arith.subf %30, %26 : vector<64x16xf32>
    %c0_17 = arith.constant 0 : index
    %c0_18 = arith.constant 0 : index
    %32 = vector.load %arg6[%c0_17, %c0_18] : memref<16x16xf32, #tpu.memory_space<vmem>>, vector<16x16xf32>
    %c0_19 = arith.constant 0 : index
    %c0_20 = arith.constant 0 : index
    %33 = vector.load %arg7[%c0_19, %c0_20] : memref<16x16xf32, #tpu.memory_space<vmem>>, vector<16x16xf32>
    %34 = arith.addf %32, %33 : vector<16x16xf32>
    %35 = vector.extract_strided_slice %29 {offsets = [0, 0], sizes = [16, 16], strides = [1, 1]} : vector<64x16xf32> to vector<16x16xf32>
    %36 = vector.extract_strided_slice %31 {offsets = [0, 0], sizes = [16, 16], strides = [1, 1]} : vector<64x16xf32> to vector<16x16xf32>
    %cst_21 = arith.constant dense<0.000000e+00> : vector<16x16xf32>
    %37 = tpu.matmul %32, %35, %cst_21 {dimension_numbers = #tpu.dot_dimension_numbers<[1], [0], [0], [1], [0, 0, 1, 1], [], []>} : vector<16x16xf32>, vector<16x16xf32>, vector<16x16xf32> -> vector<16x16xf32>
    %cst_22 = arith.constant dense<0.000000e+00> : vector<16x16xf32>
    %38 = tpu.matmul %33, %36, %cst_22 {dimension_numbers = #tpu.dot_dimension_numbers<[1], [0], [0], [1], [0, 0, 1, 1], [], []>} : vector<16x16xf32>, vector<16x16xf32>, vector<16x16xf32> -> vector<16x16xf32>
    %39 = arith.addf %35, %36 : vector<16x16xf32>
    %cst_23 = arith.constant dense<0.000000e+00> : vector<16x16xf32>
    %40 = tpu.matmul %34, %39, %cst_23 {dimension_numbers = #tpu.dot_dimension_numbers<[1], [0], [0], [1], [0, 0, 1, 1], [], []>} : vector<16x16xf32>, vector<16x16xf32>, vector<16x16xf32> -> vector<16x16xf32>
    %41 = arith.subf %37, %38 : vector<16x16xf32>
    %c0_24 = arith.constant 0 : index
    %c0_25 = arith.constant 0 : index
    %c0_26 = arith.constant 0 : index
    %c0_27 = arith.constant 0 : index
    %42 = vector.load %arg10[%c0_24, %c0_25, %c0_26, %c0_27] : memref<1x4x16x16xf32, #tpu.memory_space<vmem>>, vector<1x1x16x16xf32>
    %43 = vector.shape_cast %42 : vector<1x1x16x16xf32> to vector<16x16xf32>
    %44 = vector.shape_cast %41 : vector<16x16xf32> to vector<1x1x16x16xf32>
    tpu.vector_store %arg10[%c0_24, %c0_25, %c0_26, %c0_27], %44 {strides = array<i32>} : memref<1x4x16x16xf32, #tpu.memory_space<vmem>>, vector<1x1x16x16xf32>,
    %45 = arith.subf %40, %37 : vector<16x16xf32>
    %46 = arith.subf %45, %38 : vector<16x16xf32>
    %c0_28 = arith.constant 0 : index
    %c0_29 = arith.constant 0 : index
    %c0_30 = arith.constant 0 : index
    %c0_31 = arith.constant 0 : index
    %47 = vector.load %arg11[%c0_28, %c0_29, %c0_30, %c0_31] : memref<1x4x16x16xf32, #tpu.memory_space<vmem>>, vector<1x1x16x16xf32>
    %48 = vector.shape_cast %47 : vector<1x1x16x16xf32> to vector<16x16xf32>
    %49 = vector.shape_cast %46 : vector<16x16xf32> to vector<1x1x16x16xf32>
    tpu.vector_store %arg11[%c0_28, %c0_29, %c0_30, %c0_31], %49 {strides = array<i32>} : memref<1x4x16x16xf32, #tpu.memory_space<vmem>>, vector<1x1x16x16xf32>,
    %50 = vector.extract_strided_slice %29 {offsets = [16, 0], sizes = [16, 16], strides = [1, 1]} : vector<64x16xf32> to vector<16x16xf32>
    %51 = vector.extract_strided_slice %31 {offsets = [16, 0], sizes = [16, 16], strides = [1, 1]} : vector<64x16xf32> to vector<16x16xf32>
    %cst_32 = arith.constant dense<0.000000e+00> : vector<16x16xf32>
    %52 = tpu.matmul %32, %50, %cst_32 {dimension_numbers = #tpu.dot_dimension_numbers<[1], [0], [0], [1], [0, 0, 1, 1], [], []>} : vector<16x16xf32>, vector<16x16xf32>, vector<16x16xf32> -> vector<16x16xf32>
    %cst_33 = arith.constant dense<0.000000e+00> : vector<16x16xf32>
    %53 = tpu.matmul %33, %51, %cst_33 {dimension_numbers = #tpu.dot_dimension_numbers<[1], [0], [0], [1], [0, 0, 1, 1], [], []>} : vector<16x16xf32>, vector<16x16xf32>, vector<16x16xf32> -> vector<16x16xf32>
    %54 = arith.addf %50, %51 : vector<16x16xf32>
    %cst_34 = arith.constant dense<0.000000e+00> : vector<16x16xf32>
    %55 = tpu.matmul %34, %54, %cst_34 {dimension_numbers = #tpu.dot_dimension_numbers<[1], [0], [0], [1], [0, 0, 1, 1], [], []>} : vector<16x16xf32>, vector<16x16xf32>, vector<16x16xf32> -> vector<16x16xf32>
    %56 = arith.subf %52, %53 : vector<16x16xf32>
    %c0_35 = arith.constant 0 : index
    %c1 = arith.constant 1 : index
    %c0_36 = arith.constant 0 : index
    %c0_37 = arith.constant 0 : index
    %57 = vector.load %arg10[%c0_35, %c1, %c0_36, %c0_37] : memref<1x4x16x16xf32, #tpu.memory_space<vmem>>, vector<1x1x16x16xf32>
    %58 = vector.shape_cast %57 : vector<1x1x16x16xf32> to vector<16x16xf32>
    %59 = vector.shape_cast %56 : vector<16x16xf32> to vector<1x1x16x16xf32>
    tpu.vector_store %arg10[%c0_35, %c1, %c0_36, %c0_37], %59 {strides = array<i32>} : memref<1x4x16x16xf32, #tpu.memory_space<vmem>>, vector<1x1x16x16xf32>,
    %60 = arith.subf %55, %52 : vector<16x16xf32>
    %61 = arith.subf %60, %53 : vector<16x16xf32>
    %c0_38 = arith.constant 0 : index
    %c1_39 = arith.constant 1 : index
    %c0_40 = arith.constant 0 : index
    %c0_41 = arith.constant 0 : index
    %62 = vector.load %arg11[%c0_38, %c1_39, %c0_40, %c0_41] : memref<1x4x16x16xf32, #tpu.memory_space<vmem>>, vector<1x1x16x16xf32>
    %63 = vector.shape_cast %62 : vector<1x1x16x16xf32> to vector<16x16xf32>
    %64 = vector.shape_cast %61 : vector<16x16xf32> to vector<1x1x16x16xf32>
    tpu.vector_store %arg11[%c0_38, %c1_39, %c0_40, %c0_41], %64 {strides = array<i32>} : memref<1x4x16x16xf32, #tpu.memory_space<vmem>>, vector<1x1x16x16xf32>,
    %65 = vector.extract_strided_slice %29 {offsets = [32, 0], sizes = [16, 16], strides = [1, 1]} : vector<64x16xf32> to vector<16x16xf32>
    %66 = vector.extract_strided_slice %31 {offsets = [32, 0], sizes = [16, 16], strides = [1, 1]} : vector<64x16xf32> to vector<16x16xf32>
    %cst_42 = arith.constant dense<0.000000e+00> : vector<16x16xf32>
    %67 = tpu.matmul %32, %65, %cst_42 {dimension_numbers = #tpu.dot_dimension_numbers<[1], [0], [0], [1], [0, 0, 1, 1], [], []>} : vector<16x16xf32>, vector<16x16xf32>, vector<16x16xf32> -> vector<16x16xf32>
    %cst_43 = arith.constant dense<0.000000e+00> : vector<16x16xf32>
    %68 = tpu.matmul %33, %66, %cst_43 {dimension_numbers = #tpu.dot_dimension_numbers<[1], [0], [0], [1], [0, 0, 1, 1], [], []>} : vector<16x16xf32>, vector<16x16xf32>, vector<16x16xf32> -> vector<16x16xf32>
    %69 = arith.addf %65, %66 : vector<16x16xf32>
    %cst_44 = arith.constant dense<0.000000e+00> : vector<16x16xf32>
    %70 = tpu.matmul %34, %69, %cst_44 {dimension_numbers = #tpu.dot_dimension_numbers<[1], [0], [0], [1], [0, 0, 1, 1], [], []>} : vector<16x16xf32>, vector<16x16xf32>, vector<16x16xf32> -> vector<16x16xf32>
    %71 = arith.subf %67, %68 : vector<16x16xf32>
    %c0_45 = arith.constant 0 : index
    %c2 = arith.constant 2 : index
    %c0_46 = arith.constant 0 : index
    %c0_47 = arith.constant 0 : index
    %72 = vector.load %arg10[%c0_45, %c2, %c0_46, %c0_47] : memref<1x4x16x16xf32, #tpu.memory_space<vmem>>, vector<1x1x16x16xf32>
    %73 = vector.shape_cast %72 : vector<1x1x16x16xf32> to vector<16x16xf32>
    %74 = vector.shape_cast %71 : vector<16x16xf32> to vector<1x1x16x16xf32>
    tpu.vector_store %arg10[%c0_45, %c2, %c0_46, %c0_47], %74 {strides = array<i32>} : memref<1x4x16x16xf32, #tpu.memory_space<vmem>>, vector<1x1x16x16xf32>,
    %75 = arith.subf %70, %67 : vector<16x16xf32>
    %76 = arith.subf %75, %68 : vector<16x16xf32>
    %c0_48 = arith.constant 0 : index
    %c2_49 = arith.constant 2 : index
    %c0_50 = arith.constant 0 : index
    %c0_51 = arith.constant 0 : index
    %77 = vector.load %arg11[%c0_48, %c2_49, %c0_50, %c0_51] : memref<1x4x16x16xf32, #tpu.memory_space<vmem>>, vector<1x1x16x16xf32>
    %78 = vector.shape_cast %77 : vector<1x1x16x16xf32> to vector<16x16xf32>
    %79 = vector.shape_cast %76 : vector<16x16xf32> to vector<1x1x16x16xf32>
    tpu.vector_store %arg11[%c0_48, %c2_49, %c0_50, %c0_51], %79 {strides = array<i32>} : memref<1x4x16x16xf32, #tpu.memory_space<vmem>>, vector<1x1x16x16xf32>,
    %80 = vector.extract_strided_slice %29 {offsets = [48, 0], sizes = [16, 16], strides = [1, 1]} : vector<64x16xf32> to vector<16x16xf32>
    %81 = vector.extract_strided_slice %31 {offsets = [48, 0], sizes = [16, 16], strides = [1, 1]} : vector<64x16xf32> to vector<16x16xf32>
    %cst_52 = arith.constant dense<0.000000e+00> : vector<16x16xf32>
    %82 = tpu.matmul %32, %80, %cst_52 {dimension_numbers = #tpu.dot_dimension_numbers<[1], [0], [0], [1], [0, 0, 1, 1], [], []>} : vector<16x16xf32>, vector<16x16xf32>, vector<16x16xf32> -> vector<16x16xf32>
    %cst_53 = arith.constant dense<0.000000e+00> : vector<16x16xf32>
    %83 = tpu.matmul %33, %81, %cst_53 {dimension_numbers = #tpu.dot_dimension_numbers<[1], [0], [0], [1], [0, 0, 1, 1], [], []>} : vector<16x16xf32>, vector<16x16xf32>, vector<16x16xf32> -> vector<16x16xf32>
    %84 = arith.addf %80, %81 : vector<16x16xf32>
    %cst_54 = arith.constant dense<0.000000e+00> : vector<16x16xf32>
    %85 = tpu.matmul %34, %84, %cst_54 {dimension_numbers = #tpu.dot_dimension_numbers<[1], [0], [0], [1], [0, 0, 1, 1], [], []>} : vector<16x16xf32>, vector<16x16xf32>, vector<16x16xf32> -> vector<16x16xf32>
    %86 = arith.subf %82, %83 : vector<16x16xf32>
    %c0_55 = arith.constant 0 : index
    %c3 = arith.constant 3 : index
    %c0_56 = arith.constant 0 : index
    %c0_57 = arith.constant 0 : index
    %87 = vector.load %arg10[%c0_55, %c3, %c0_56, %c0_57] : memref<1x4x16x16xf32, #tpu.memory_space<vmem>>, vector<1x1x16x16xf32>
    %88 = vector.shape_cast %87 : vector<1x1x16x16xf32> to vector<16x16xf32>
    %89 = vector.shape_cast %86 : vector<16x16xf32> to vector<1x1x16x16xf32>
    tpu.vector_store %arg10[%c0_55, %c3, %c0_56, %c0_57], %89 {strides = array<i32>} : memref<1x4x16x16xf32, #tpu.memory_space<vmem>>, vector<1x1x16x16xf32>,
    %90 = arith.subf %85, %82 : vector<16x16xf32>
    %91 = arith.subf %90, %83 : vector<16x16xf32>
    %c0_58 = arith.constant 0 : index
    %c3_59 = arith.constant 3 : index
    %c0_60 = arith.constant 0 : index
    %c0_61 = arith.constant 0 : index
    %92 = vector.load %arg11[%c0_58, %c3_59, %c0_60, %c0_61] : memref<1x4x16x16xf32, #tpu.memory_space<vmem>>, vector<1x1x16x16xf32>
    %93 = vector.shape_cast %92 : vector<1x1x16x16xf32> to vector<16x16xf32>
    %94 = vector.shape_cast %91 : vector<16x16xf32> to vector<1x1x16x16xf32>
    tpu.vector_store %arg11[%c0_58, %c3_59, %c0_60, %c0_61], %94 {strides = array<i32>} : memref<1x4x16x16xf32, #tpu.memory_space<vmem>>, vector<1x1x16x16xf32>,
    return
  }
  func.func @transform_0(%arg0: i32, %arg1: i32) -> (i32, i32, i32) {
    %c0_i32 = arith.constant 0 : i32
    %c0_i32_0 = arith.constant 0 : i32
    %c0_i32_1 = arith.constant 0 : i32
    return %arg0, %c0_i32, %c0_i32_0 : i32, i32, i32
  }
  func.func @transform_1(%arg0: i32, %arg1: i32) -> (i32, i32, i32) {
    %c0_i32 = arith.constant 0 : i32
    %c0_i32_0 = arith.constant 0 : i32
    %c0_i32_1 = arith.constant 0 : i32
    return %arg0, %c0_i32, %c0_i32_0 : i32, i32, i32
  }
  func.func @transform_2(%arg0: i32, %arg1: i32) -> (i32, i32, i32) {
    %c0_i32 = arith.constant 0 : i32
    %c0_i32_0 = arith.constant 0 : i32
    %c0_i32_1 = arith.constant 0 : i32
    return %arg1, %c0_i32, %c0_i32_0 : i32, i32, i32
  }
  func.func @transform_3(%arg0: i32, %arg1: i32) -> (i32, i32, i32) {
    %c0_i32 = arith.constant 0 : i32
    %c0_i32_0 = arith.constant 0 : i32
    %c0_i32_1 = arith.constant 0 : i32
    return %arg1, %c0_i32, %c0_i32_0 : i32, i32, i32
  }
  func.func @transform_4(%arg0: i32, %arg1: i32) -> (i32, i32) {
    %c0_i32 = arith.constant 0 : i32
    %c0_i32_0 = arith.constant 0 : i32
    %c0_i32_1 = arith.constant 0 : i32
    return %c0_i32, %c0_i32_0 : i32, i32
  }
  func.func @transform_5(%arg0: i32, %arg1: i32) -> (i32, i32) {
    %c0_i32 = arith.constant 0 : i32
    %c0_i32_0 = arith.constant 0 : i32
    %c0_i32_1 = arith.constant 0 : i32
    return %c0_i32, %c0_i32_0 : i32, i32
  }
  func.func @transform_6(%arg0: i32, %arg1: i32) -> (i32, i32) {
    %c0_i32 = arith.constant 0 : i32
    %c0_i32_0 = arith.constant 0 : i32
    %c0_i32_1 = arith.constant 0 : i32
    return %c0_i32, %c0_i32_0 : i32, i32
  }
  func.func @transform_7(%arg0: i32, %arg1: i32) -> (i32, i32) {
    %c0_i32 = arith.constant 0 : i32
    %c0_i32_0 = arith.constant 0 : i32
    %c0_i32_1 = arith.constant 0 : i32
    return %c0_i32, %c0_i32_0 : i32, i32
  }
  func.func @transform_8(%arg0: i32, %arg1: i32) -> (i32, i32, i32, i32) {
    %c0_i32 = arith.constant 0 : i32
    %c0_i32_0 = arith.constant 0 : i32
    %c0_i32_1 = arith.constant 0 : i32
    return %arg0, %arg1, %c0_i32, %c0_i32_0 : i32, i32, i32, i32
  }
  func.func @transform_9(%arg0: i32, %arg1: i32) -> (i32, i32, i32, i32) {
    %c0_i32 = arith.constant 0 : i32
    %c0_i32_0 = arith.constant 0 : i32
    %c0_i32_1 = arith.constant 0 : i32
    return %arg0, %arg1, %c0_i32, %c0_i32_0 : i32, i32, i32, i32
  }
}

</mosaic_0001>

<bundles_post_ra>
// kernel: _forward_impl.1
= control target key start
LH: loop header
LB: loop body
LE: loop exit
PB: predicated region body
PF: predicated region fallthrough
CT: control target
= control target key end

     0   :  { %s1474_s30 = smov 0   ;;  %s1476_s10 = smov 0   ;;  %s1741_s0 = inlined_call_operand.vmem [shape: f32[2,16,16], index: 0, kind: input, shape index: {}]   ;;  %s1742_s1 = inlined_call_operand.vmem [shape: f32[2,16,16], index: 1, kind: input, shape index: {}]   ;;  %s1743_s2 = inlined_call_operand.vmem [shape: f32[4,16,16], index: 2, kind: input, shape index: {}]   ;;  %s1744_s3 = inlined_call_operand.vmem [shape: f32[4,16,16], index: 3, kind: input, shape index: {}]   ;;  %s1745_s4 = inlined_call_operand.vmem [shape: f32[16,16], index: 4, kind: input, shape index: {}]   ;;  %s1746_s5 = inlined_call_operand.vmem [shape: f32[16,16], index: 5, kind: input, shape index: {}]   ;;  %s1747_s6 = inlined_call_operand.vmem [shape: f32[16,16], index: 6, kind: input, shape index: {}]   ;;  %s1748_s7 = inlined_call_operand.vmem [shape: f32[16,16], index: 7, kind: input, shape index: {}]   ;;  %s1749_s8 = inlined_call_operand.vmem [shape: f32[2,4,16,16], index: 8, kind: output, shape index: {0}]   ;;  %s1750_s9 = inlined_call_operand.vmem [shape: f32[2,4,16,16], index: 9, kind: output, shape index: {1}]  }
   0x1   :  { %s1478_s11 = smov 0  }
   0x2 LB: > { %s32_s12 = sadd.s32 1, %s1418_s10  ;;  %p1301_p0 = scmp.ge.s32.totalorder %s1422_s11, 1  ;;  %s1422_s11 = sphi %s1478_s11, %s20_s11   ;;  %s1418_s10 = sphi %s1476_s10, %s1752_s10   ;;  %s1414_s30 = sphi %s1474_s30, %s1751_s30  }
   0x3   : > { %p34_p1 = scmp.ge.s32.totalorder %s32_s12, 2  ;;  %p340_p2 = scmp.lt.s32.totalorder %s1422_s11, 3 }
   0x5   : > { %s1754_s12 = smov (%p34_p1, %s32_s12), 0  ;;  %p341_p3 = pnand %p1301_p0, %p340_p2 }
   0x6   : > { %p408_p4 = scmp.lt.s32.totalorder (!%p341_p3), %s1414_s30, 1 }
   0x7   : > { %344 = sbr.rel (%p341_p3) target bundleno = 387 (0x183), region = 52 }
   0xc   : > { %v523_v0 = vld [vmem:[%s1747_s6 + $0x8] sm:$0xff]  ;;  %v522_v2 = vld [vmem:[%s1747_s6] sm:$0xff]  ;;  %s1756_s30 = smov (!%p408_p4, %s1414_s30), 1  ;;  %vm528_vm0 = vcmask 130048   ;;  %v460_v27 = vld [vmem:[%s1743_s2 + $0x10] sm:$0xff] }
   0xd   : > { %v525_v1 = vld [vmem:[%s1748_s7 + $0x8] sm:$0xff]  ;;  %567 = vmatpush.msra.mxu0 %v523_v0  ;;  %v524_v3 = vld [vmem:[%s1748_s7] sm:$0xff]  ;;  %s1372_s21 = sshll.u32 %s1756_s30, 4  ;;  %v468_v28 = vld [vmem:[%s1744_s3 + $0x10] sm:$0xff]  ;;  %s1374_s17 = sshll.u32 %s1756_s30, 6 }
   0xe   : > { %632 = vmatpush.msra.mxu1 %v525_v1  ;;  %v527_v4 = vadd.f32 %v525_v1, %v523_v0  ;;  %v526_v5 = vadd.f32 %v524_v3, %v522_v2  ;;  %v458_v6 = vld [vmem:[%s1743_s2] sm:$0xff]  ;;  %s412_s28 = scalar_lea.vmem %s1741_s0, %s1372_s21  ;;  %s417_s14 = scalar_lea.vmem %s1742_s1, %s1372_s21  ;;  %v459_v8 = vld [vmem:[%s1743_s2 + $0x8] sm:$0xff]  ;;  %v461_v36 = vld [vmem:[%s1743_s2 + $0x18] sm:$0xff] }
   0xf   : > { %568 = vmatpush.msra.mxu0 %v522_v2  ;;  %v466_v7 = vld [vmem:[%s1744_s3] sm:$0xff]  ;;  %v467_v9 = vld [vmem:[%s1744_s3 + $0x8] sm:$0xff]  ;;  %v469_v37 = vld [vmem:[%s1744_s3 + $0x18] sm:$0xff]  ;;  %s1693_s20 = scalar_lea.vmem %s1749_s8, %s1374_s17  ;;  %s1702_s30 = scalar_lea.vmem %s1750_s9, %s1374_s17 }
  0x10   : > { %633 = vmatpush.msra.mxu1 %v524_v3  ;;  %705 = vmatpush.msra.mxu2 %v527_v4  ;;  %v1525_v10 = vld [vmem:[%s412_s28] sm:$0xff]  ;;  %v1529_v12 = vld [vmem:[%s412_s28 + $0x8] sm:$0xff]  ;;  %v464_v63 = vld [vmem:[%s1743_s2 + $0x30] sm:$0xff] }
  0x11   : > { %v1527_v11 = vld [vmem:[%s417_s14] sm:$0xff]  ;;  %v474_v13 = vmul.f32 %v458_v6, %v1525_v10  ;;  %v498_v15 = vmul.f32 %v466_v7, %v1525_v10  ;;  %v1535_v17 = vld [vmem:[%s417_s14 + $0x8] sm:$0xff]  ;;  %v475_v18 = vmul.f32 %v459_v8, %v1529_v12  ;;  %v499_v22 = vmul.f32 %v467_v9, %v1529_v12  ;;  %v472_v0 = vld [vmem:[%s1744_s3 + $0x30] sm:$0xff] }
  0x12   : > { %706 = vmatpush.msra.mxu2 %v526_v5  ;;  %v482_v14 = vmul.f32 %v466_v7, %v1527_v11  ;;  %v506_v16 = vmul.f32 %v458_v6, %v1527_v11  ;;  %v483_v19 = vmul.f32 %v467_v9, %v1535_v17  ;;  %v507_v23 = vmul.f32 %v459_v8, %v1535_v17  ;;  %v462_v45 = vld [vmem:[%s1743_s2 + $0x20] sm:$0xff]  ;;  %v463_v54 = vld [vmem:[%s1743_s2 + $0x28] sm:$0xff]  ;;  %v465_v8 = vld [vmem:[%s1743_s2 + $0x38] sm:$0xff] }
  0x13   : > { %v476_v29 = vmul.f32 %v460_v27, %v1525_v10  ;;  %v484_v31 = vmul.f32 %v468_v28, %v1527_v11  ;;  %v500_v32 = vmul.f32 %v468_v28, %v1525_v10  ;;  %v508_v33 = vmul.f32 %v460_v27, %v1527_v11  ;;  %v470_v46 = vld [vmem:[%s1744_s3 + $0x20] sm:$0xff]  ;;  %v471_v55 = vld [vmem:[%s1744_s3 + $0x28] sm:$0xff]  ;;  %v473_v9 = vld [vmem:[%s1744_s3 + $0x38] sm:$0xff] }
  0x14   : > { %v490_v20 = vsub.f32 %v474_v13, %v482_v14  ;;  %v514_v21 = vadd.f32 %v506_v16, %v498_v15  ;;  %v491_v25 = vsub.f32 %v475_v18, %v483_v19  ;;  %v515_v26 = vadd.f32 %v507_v23, %v499_v22 }
  0x15   : > { %v492_v34 = vsub.f32 %v476_v29, %v484_v31  ;;  %v516_v35 = vadd.f32 %v508_v33, %v500_v32  ;;  %v477_v38 = vmul.f32 %v461_v36, %v1529_v12  ;;  %v485_v40 = vmul.f32 %v469_v37, %v1535_v17  ;;  %v1635_v32 = vld [vmem:[%s1745_s4 + $0x8] sm:$0xff] }
  0x16   : > { %1310 = vmatmul.msk.f32.vlgmr.msra.gmra.mxu0 %vm528_vm0, %v490_v20  ;;  %1318 = vmatmul.msk.f32.vlgmr.msra.gmra.mxu1 %vm528_vm0, %v514_v21  ;;  %v659_v24 = vadd.f32 %v514_v21, %v490_v20  ;;  %v660_v30 = vadd.f32 %v515_v26, %v491_v25  ;;  %v501_v41 = vmul.f32 %v469_v37, %v1529_v12 }
  0x17   : > { %v661_v39 = vadd.f32 %v516_v35, %v492_v34  ;;  %v509_v42 = vmul.f32 %v461_v36, %v1535_v17  ;;  %v493_v43 = vsub.f32 %v477_v38, %v485_v40  ;;  %v478_v47 = vmul.f32 %v462_v45, %v1525_v10  ;;  %v1642_v40 = vld [vmem:[%s1746_s5] sm:$0xff] }
  0x18   : > { %1326 = vmatmul.msk.f32.vlgmr.msra.gmra.mxu2 %vm528_vm0, %v659_v24  ;;  %v486_v49 = vmul.f32 %v470_v46, %v1527_v11  ;;  %v502_v50 = vmul.f32 %v470_v46, %v1525_v10  ;;  %v510_v51 = vmul.f32 %v462_v45, %v1527_v11  ;;  %v479_v56 = vmul.f32 %v463_v54, %v1529_v12 }
  0x19   : > { %v517_v44 = vadd.f32 %v509_v42, %v501_v41  ;;  %v487_v58 = vmul.f32 %v471_v55, %v1535_v17  ;;  %v503_v59 = vmul.f32 %v471_v55, %v1529_v12  ;;  %v511_v60 = vmul.f32 %v463_v54, %v1535_v17 }
  0x1a   : > { %v494_v52 = vsub.f32 %v478_v47, %v486_v49  ;;  %v518_v53 = vadd.f32 %v510_v51, %v502_v50  ;;  %v480_v1 = vmul.f32 %v464_v63, %v1525_v10  ;;  %v488_v2 = vmul.f32 %v472_v0, %v1527_v11  ;;  %v1649_v49 = vld [vmem:[%s1746_s5 + $0x8] sm:$0xff] }
  0x1b   : > { %v662_v48 = vadd.f32 %v517_v44, %v493_v43  ;;  %v495_v61 = vsub.f32 %v479_v56, %v487_v58  ;;  %v519_v62 = vadd.f32 %v511_v60, %v503_v59  ;;  %v504_v3 = vmul.f32 %v472_v0, %v1525_v10 }
  0x1c   : > { %v663_v57 = vadd.f32 %v518_v53, %v494_v52  ;;  %v512_v4 = vmul.f32 %v464_v63, %v1527_v11  ;;  %v496_v6 = vsub.f32 %v480_v1, %v488_v2  ;;  %v481_v11 = vmul.f32 %v465_v8, %v1529_v12 }
  0x1d   : > { %v664_v5 = vadd.f32 %v519_v62, %v495_v61  ;;  %v489_v13 = vmul.f32 %v473_v9, %v1535_v17  ;;  %v505_v14 = vmul.f32 %v473_v9, %v1529_v12  ;;  %v513_v15 = vmul.f32 %v465_v8, %v1535_v17 }
  0x1e   : > { %1311 = vmatmul.msk.f32.gmra.mxu0 %vm528_vm0, %v491_v25  ;;  %1319 = vmatmul.msk.f32.gmra.mxu1 %vm528_vm0, %v515_v26  ;;  %v520_v7 = vadd.f32 %v512_v4, %v504_v3  ;;  %v1628_v25 = vld [vmem:[%s1745_s4] sm:$0xff] }
  0x1f   : > { %v497_v16 = vsub.f32 %v481_v11, %v489_v13  ;;  %v521_v18 = vadd.f32 %v513_v15, %v505_v14 }
  0x20   : > { %1327 = vmatmul.msk.f32.gmra.mxu2 %vm528_vm0, %v660_v30  ;;  %v665_v10 = vadd.f32 %v520_v7, %v496_v6 }
  0x21   : > { %v666_v19 = vadd.f32 %v521_v18, %v497_v16 }
  0x26   : > { %1312 = vmatmul.msk.f32.gmra.mxu0 %vm528_vm0, %v492_v34  ;;  %1320 = vmatmul.msk.f32.gmra.mxu1 %vm528_vm0, %v516_v35 }
  0x28   : > { %1328 = vmatmul.msk.f32.gmra.mxu2 %vm528_vm0, %v661_v39 }
  0x2e   : > { %1313 = vmatmul.msk.f32.gmra.mxu0 %vm528_vm0, %v493_v43  ;;  %1321 = vmatmul.msk.f32.gmra.mxu1 %vm528_vm0, %v517_v44 }
  0x30   : > { %1329 = vmatmul.msk.f32.gmra.mxu2 %vm528_vm0, %v662_v48 }
  0x36   : > { %1314 = vmatmul.msk.f32.gmra.mxu0 %vm528_vm0, %v494_v52  ;;  %1322 = vmatmul.msk.f32.gmra.mxu1 %vm528_vm0, %v518_v53 }
  0x38   : > { %1330 = vmatmul.msk.f32.gmra.mxu2 %vm528_vm0, %v663_v57  ;;  %v760_v57 = vadd.f32 %v1642_v40, %v1628_v25 }
  0x3e   : > { %1315 = vmatmul.msk.f32.gmra.mxu0 %vm528_vm0, %v495_v61  ;;  %1323 = vmatmul.msk.f32.gmra.mxu1 %vm528_vm0, %v519_v62  ;;  %v761_v62 = vadd.f32 %v1649_v49, %v1635_v32 }
  0x40   : > { %1331 = vmatmul.msk.f32.gmra.mxu2 %vm528_vm0, %v664_v5 }
  0x46   : > { %1316 = vmatmul.msk.f32.gmra.mxu0 %vm528_vm0, %v496_v6  ;;  %1324 = vmatmul.msk.f32.gmra.mxu1 %vm528_vm0, %v520_v7 }
  0x48   : > { %1332 = vmatmul.msk.f32.gmra.mxu2 %vm528_vm0, %v665_v10 }
  0x4e   : > { %1317 = vmatmul.msk.f32.gmra.mxu0 %vm528_vm0, %v497_v16  ;;  %1325 = vmatmul.msk.f32.gmra.mxu1 %vm528_vm0, %v521_v18 }
  0x50   : > { %1333 = vmatmul.msk.f32.gmra.mxu2 %vm528_vm0, %v666_v19 }
  0x93   : > { %v570_v20 = vpop.f32.mrf.mxu0  ;;  %v635_v21 = vpop.f32.mrf.mxu1 }
  0x94   : > { %v732_v24 = vsub.f32 %v570_v20, %v635_v21 }
  0x9b   : > { %v573_v12 = vpop.f32.mrf.mxu0  ;;  %v638_v22 = vpop.f32.mrf.mxu1 }
  0x9c   : > { %v708_v17 = vpop.f32.mrf.mxu2  ;;  %v733_v23 = vsub.f32 %v573_v12, %v638_v22 }
  0x9d   : > { %v740_v28 = vsub.f32 %v708_v17, %v570_v20 }
  0x9e   : > { %782 = vmatpush.msra.mxu3 %v733_v23 }
  0x9f   : > { %v748_v33 = vsub.f32 %v740_v28, %v635_v21 }
  0xa0   : > { %783 = vmatpush.msra.mxu3 %v732_v24 }
  0xa1   : > { %1334 = vmatmul.msk.f32.vlgmr.msra.gmra.mxu3 %vm528_vm0, %v1628_v25  ;;  %v820_v37 = vadd.f32 %v748_v33, %v732_v24 }
  0xa3   : > { %v576_v26 = vpop.f32.mrf.mxu0  ;;  %v641_v27 = vpop.f32.mrf.mxu1 }
  0xa4   : > { %v711_v29 = vpop.f32.mrf.mxu2  ;;  %v734_v41 = vsub.f32 %v576_v26, %v641_v27 }
  0xa5   : > { %v741_v30 = vsub.f32 %v711_v29, %v573_v12 }
  0xa7   : > { %v749_v31 = vsub.f32 %v741_v30, %v638_v22 }
  0xa9   : > { %811 = vmatpush.msrb.mxu3 %v749_v31  ;;  %v821_v34 = vadd.f32 %v749_v31, %v733_v23 }
  0xaa   : > { %1335 = vmatmul.msk.f32.gmra.mxu3 %vm528_vm0, %v1635_v32 }
  0xab   : > { %812 = vmatpush.msrb.mxu3 %v748_v33  ;;  %v579_v35 = vpop.f32.mrf.mxu0  ;;  %v644_v36 = vpop.f32.mrf.mxu1 }
  0xac   : > { %v714_v38 = vpop.f32.mrf.mxu2  ;;  %v735_v39 = vsub.f32 %v579_v35, %v644_v36 }
  0xad   : > { %842 = vmatpush.msra.mxu3 %v821_v34  ;;  %v742_v42 = vsub.f32 %v714_v38, %v576_v26 }
  0xaf   : > { %843 = vmatpush.msra.mxu3 %v820_v37  ;;  %v750_v47 = vsub.f32 %v742_v42, %v641_v27 }
  0xb1   : > { %v907_v51 = vadd.f32 %v750_v47, %v734_v41 }
  0xb2   : > { %1336 = vmatmul.msk.f32.vlgmr.msrb.gmra.mxu3 %vm528_vm0, %v1642_v40 }
  0xb3   : > { %875 = vmatpush.msrb.mxu3 %v735_v39  ;;  %v582_v43 = vpop.f32.mrf.mxu0  ;;  %v647_v44 = vpop.f32.mrf.mxu1 }
  0xb4   : > { %v717_v45 = vpop.f32.mrf.mxu2  ;;  %v736_v56 = vsub.f32 %v582_v43, %v647_v44 }
  0xb5   : > { %v743_v46 = vsub.f32 %v717_v45, %v579_v35  ;;  %876 = vmatpush.msrb.mxu3 %v734_v41 }
  0xb7   : > { %v751_v48 = vsub.f32 %v743_v46, %v644_v36 }
  0xb9   : > { %898 = vmatpush.msrb.mxu0 %v751_v48  ;;  %v908_v50 = vadd.f32 %v751_v48, %v735_v39 }
  0xba   : > { %1337 = vmatmul.msk.f32.gmra.mxu3 %vm528_vm0, %v1649_v49 }
  0xbb   : > { %899 = vmatpush.msrb.mxu0 %v750_v47  ;;  %923 = vmatpush.msrb.mxu1 %v908_v50  ;;  %v585_v52 = vpop.f32.mrf.mxu0  ;;  %v650_v53 = vpop.f32.mrf.mxu1 }
  0xbc   : > { %v720_v54 = vpop.f32.mrf.mxu2  ;;  %v737_v55 = vsub.f32 %v585_v52, %v650_v53  ;;  %1342 = vmatmul.msk.f32.vlgmr.msrb.gmra.mxu0 %vm528_vm0, %v1642_v40 }
  0xbd   : > { %924 = vmatpush.msrb.mxu1 %v907_v51  ;;  %v744_v58 = vsub.f32 %v720_v54, %v582_v43 }
  0xbe   : > { %958 = vmatpush.msrb.mxu2 %v737_v55  ;;  %1344 = vmatmul.msk.f32.vlgmr.msrb.gmra.mxu1 %vm528_vm0, %v760_v57 }
  0xbf   : > { %v752_v63 = vsub.f32 %v744_v58, %v647_v44 }
  0xc0   : > { %959 = vmatpush.msrb.mxu2 %v736_v56 }
  0xc1   : > { %1350 = vmatmul.msk.f32.vlgmr.msrb.gmra.mxu2 %vm528_vm0, %v1628_v25  ;;  %v990_v2 = vadd.f32 %v752_v63, %v736_v56 }
  0xc2   : > { %1338 = vmatmul.msk.f32.vlgmr.msra.gmra.mxu3 %vm528_vm0, %v760_v57 }
  0xc3   : > { %v588_v59 = vpop.f32.mrf.mxu0  ;;  %v653_v60 = vpop.f32.mrf.mxu1 }
  0xc4   : > { %v723_v61 = vpop.f32.mrf.mxu2  ;;  %1343 = vmatmul.msk.f32.gmra.mxu0 %vm528_vm0, %v1649_v49  ;;  %v738_v7 = vsub.f32 %v588_v59, %v653_v60 }
  0xc5   : > { %v745_v0 = vsub.f32 %v723_v61, %v585_v52 }
  0xc6   : > { %1345 = vmatmul.msk.f32.gmra.mxu1 %vm528_vm0, %v761_v62 }
  0xc7   : > { %v753_v1 = vsub.f32 %v745_v0, %v650_v53 }
  0xc9   : > { %v991_v3 = vadd.f32 %v753_v1, %v737_v55  ;;  %981 = vmatpush.msra.mxu3 %v753_v1  ;;  %1351 = vmatmul.msk.f32.gmra.mxu2 %vm528_vm0, %v1635_v32 }
  0xca   : > { %1339 = vmatmul.msk.f32.gmra.mxu3 %vm528_vm0, %v761_v62 }
  0xcb   : > { %982 = vmatpush.msra.mxu3 %v752_v63  ;;  %1006 = vmatpush.msra.mxu0 %v991_v3  ;;  %v591_v4 = vpop.f32.mrf.mxu0  ;;  %v656_v5 = vpop.f32.mrf.mxu1 }
  0xcc   : > { %v726_v6 = vpop.f32.mrf.mxu2  ;;  %v739_v8 = vsub.f32 %v591_v4, %v656_v5 }
  0xcd   : > { %1007 = vmatpush.msra.mxu0 %v990_v2  ;;  %v746_v9 = vsub.f32 %v726_v6, %v588_v59 }
  0xce   : > { %1041 = vmatpush.msra.mxu1 %v739_v8  ;;  %1354 = vmatmul.msk.f32.vlgmr.msra.gmra.mxu0 %vm528_vm0, %v760_v57 }
  0xcf   : > { %v754_v11 = vsub.f32 %v746_v9, %v653_v60 }
  0xd0   : > { %1042 = vmatpush.msra.mxu1 %v738_v7 }
  0xd1   : > { %1360 = vmatmul.msk.f32.vlgmr.msra.gmra.mxu1 %vm528_vm0, %v1628_v25  ;;  %v1073_v15 = vadd.f32 %v754_v11, %v738_v7 }
  0xd2   : > { %1340 = vmatmul.msk.f32.vlgmr.msrb.gmra.mxu3 %vm528_vm0, %v1628_v25 }
  0xd4   : > { %v729_v10 = vpop.f32.mrf.mxu2 }
  0xd5   : > { %v747_v13 = vsub.f32 %v729_v10, %v591_v4 }
  0xd6   : > { %1355 = vmatmul.msk.f32.gmra.mxu0 %vm528_vm0, %v761_v62 }
  0xd7   : > { %v755_v14 = vsub.f32 %v747_v13, %v656_v5 }
  0xd9   : > { %v1074_v16 = vadd.f32 %v755_v14, %v739_v8  ;;  %1064 = vmatpush.msra.mxu2 %v755_v14  ;;  %1361 = vmatmul.msk.f32.gmra.mxu1 %vm528_vm0, %v1635_v32 }
  0xda   : > { %1341 = vmatmul.msk.f32.gmra.mxu3 %vm528_vm0, %v1635_v32 }
  0xdb   : > { %1089 = vmatpush.msrb.mxu3 %v1074_v16  ;;  %1065 = vmatpush.msra.mxu2 %v754_v11 }
  0xdc   : > { %1362 = vmatmul.msk.f32.vlgmr.msra.gmra.mxu2 %vm528_vm0, %v1642_v40 }
  0xdd   : > { %1090 = vmatpush.msrb.mxu3 %v1073_v15 }
  0xe2   : > { %1352 = vmatmul.msk.f32.vlgmr.msra.gmra.mxu3 %vm528_vm0, %v1642_v40 }
  0xe4   : > { %1363 = vmatmul.msk.f32.gmra.mxu2 %vm528_vm0, %v1649_v49 }
  0xea   : > { %1353 = vmatmul.msk.f32.gmra.mxu3 %vm528_vm0, %v1649_v49 }
  0xf2   : > { %1364 = vmatmul.msk.f32.vlgmr.msrb.gmra.mxu3 %vm528_vm0, %v760_v57 }
  0xfa   : > { %1365 = vmatmul.msk.f32.gmra.mxu3 %vm528_vm0, %v761_v62 }
 0x124   : > { %v785_v18 = vpop.f32.mrf.mxu3 }
 0x12d   : > { %v788_v19 = vpop.f32.mrf.mxu3 }
 0x135   : > { %v814_v20 = vpop.f32.mrf.mxu3 }
 0x136   : > { %v851_v21 = vsub.f32 %v785_v18, %v814_v20 }
 0x138   : > { %853 = vst.msk [vmem:[%s1693_s20] sm:$0xff] %vm528_vm0, %v851_v21 }
 0x139   : > { %v901_v25 = vpop.f32.mrf.mxu0 }
 0x13b   : > { %v926_v26 = vpop.f32.mrf.mxu1 }
 0x13d   : > { %v817_v12 = vpop.f32.mrf.mxu3 }
 0x13e   : > { %v852_v22 = vsub.f32 %v788_v19, %v817_v12 }
 0x140   : > { %854 = vst.msk [vmem:[%s1693_s20 + $0x8] sm:$0xff] %vm528_vm0, %v852_v22 }
 0x141   : > { %v904_v31 = vpop.f32.mrf.mxu0 }
 0x143   : > { %v929_v32 = vpop.f32.mrf.mxu1 }
 0x144   : > { %v961_v28 = vpop.f32.mrf.mxu2 }
 0x145   : > { %v845_v17 = vpop.f32.mrf.mxu3 }
 0x146   : > { %v855_v23 = vsub.f32 %v845_v17, %v785_v18 }
 0x148   : > { %v857_v24 = vsub.f32 %v855_v23, %v814_v20 }
 0x14a   : > { %859 = vst.msk [vmem:[%s1702_s30] sm:$0xff] %vm528_vm0, %v857_v24 }
 0x14b   : > { %v1009_v40 = vpop.f32.mrf.mxu0 }
 0x14c   : > { %v964_v36 = vpop.f32.mrf.mxu2  ;;  %v1020_v46 = vsub.f32 %v1009_v40, %v961_v28 }
 0x14d   : > { %v848_v27 = vpop.f32.mrf.mxu3 }
 0x14e   : > { %v856_v29 = vsub.f32 %v848_v27, %v788_v19  ;;  %v1044_v38 = vpop.f32.mrf.mxu1 }
 0x150   : > { %v858_v30 = vsub.f32 %v856_v29, %v817_v12 }
 0x152   : > { %860 = vst.msk [vmem:[%s1702_s30 + $0x8] sm:$0xff] %vm528_vm0, %v858_v30 }
 0x153   : > { %v1012_v51 = vpop.f32.mrf.mxu0 }
 0x154   : > { %v1021_v54 = vsub.f32 %v1012_v51, %v964_v36 }
 0x155   : > { %v878_v33 = vpop.f32.mrf.mxu3 }
 0x156   : > { %v932_v34 = vsub.f32 %v878_v33, %v901_v25  ;;  %v937_v35 = vsub.f32 %v926_v26, %v878_v33  ;;  %v1047_v48 = vpop.f32.mrf.mxu1 }
 0x158   : > { %1346 = vst.msk [vmem:[%s1693_s20 + $0x10] sm:$0xff] %vm528_vm0, %v932_v34  ;;  %v939_v37 = vsub.f32 %v937_v35, %v901_v25 }
 0x15a   : > { %1348 = vst.msk [vmem:[%s1702_s30 + $0x10] sm:$0xff] %vm528_vm0, %v939_v37 }
 0x15d   : > { %v881_v39 = vpop.f32.mrf.mxu3 }
 0x15e   : > { %v933_v41 = vsub.f32 %v881_v39, %v904_v31  ;;  %v938_v42 = vsub.f32 %v929_v32, %v881_v39 }
 0x15f   : > { %v1067_v43 = vpop.f32.mrf.mxu2 }
 0x160   : > { %1347 = vst.msk [vmem:[%s1693_s20 + $0x18] sm:$0xff] %vm528_vm0, %v933_v41  ;;  %v940_v44 = vsub.f32 %v938_v42, %v904_v31  ;;  %v1098_v45 = vsub.f32 %v1044_v38, %v1067_v43 }
 0x162   : > { %1349 = vst.msk [vmem:[%s1702_s30 + $0x18] sm:$0xff] %vm528_vm0, %v940_v44 }
 0x163   : > { %1366 = vst.msk [vmem:[%s1693_s20 + $0x30] sm:$0xff] %vm528_vm0, %v1098_v45 }
 0x165   : > { %v984_v47 = vpop.f32.mrf.mxu3 }
 0x166   : > { %v1015_v49 = vsub.f32 %v961_v28, %v984_v47  ;;  %v1022_v50 = vsub.f32 %v1020_v46, %v984_v47 }
 0x167   : > { %v1070_v52 = vpop.f32.mrf.mxu2 }
 0x168   : > { %1356 = vst.msk [vmem:[%s1693_s20 + $0x20] sm:$0xff] %vm528_vm0, %v1015_v49  ;;  %v1099_v53 = vsub.f32 %v1047_v48, %v1070_v52 }
 0x169   : > { %1358 = vst.msk [vmem:[%s1702_s30 + $0x20] sm:$0xff] %vm528_vm0, %v1022_v50 }
 0x16a   : > { %1367 = vst.msk [vmem:[%s1693_s20 + $0x38] sm:$0xff] %vm528_vm0, %v1099_v53 }
 0x16d   : > { %v987_v55 = vpop.f32.mrf.mxu3 }
 0x16e   : > { %v1016_v56 = vsub.f32 %v964_v36, %v987_v55  ;;  %v1023_v57 = vsub.f32 %v1021_v54, %v987_v55 }
 0x170   : > { %1357 = vst.msk [vmem:[%s1693_s20 + $0x28] sm:$0xff] %vm528_vm0, %v1016_v56 }
 0x171   : > { %1359 = vst.msk [vmem:[%s1702_s30 + $0x28] sm:$0xff] %vm528_vm0, %v1023_v57 }
 0x175   : > { %v1092_v58 = vpop.f32.mrf.mxu3 }
 0x176   : > { %v1103_v59 = vsub.f32 %v1092_v58, %v1044_v38 }
 0x178   : > { %v1105_v60 = vsub.f32 %v1103_v59, %v1067_v43 }
 0x17a   : > { %1368 = vst.msk [vmem:[%s1702_s30 + $0x30] sm:$0xff] %vm528_vm0, %v1105_v60 }
 0x17d   : > { %v1095_v61 = vpop.f32.mrf.mxu3 }
 0x17e   : > { %v1104_v62 = vsub.f32 %v1095_v61, %v1047_v48 }
 0x180   : > { %v1106_v63 = vsub.f32 %v1104_v62, %v1070_v52 }
 0x182   : > { %1369 = vst.msk [vmem:[%s1702_s30 + $0x38] sm:$0xff] %vm528_vm0, %v1106_v63 }
 0x183 PF: > { %s20_s11 = sadd.s32 1, %s1422_s11   ;;  %s1751_s30 = smov %s1418_s10 }
 0x184   : > { %p17_p5 = scmp.ge.s32.totalorder %s20_s11, 4   ;;  %s1752_s10 = smov %s1754_s12 }
 0x186   :  { %19 = sbr.rel (!%p17_p5) target bundleno = 2 (0x2), region = 109 }

// kernel: _forward_impl.1
= control target key start
LH: loop header
LB: loop body
LE: loop exit
PB: predicated region body
PF: predicated region fallthrough
CT: control target
= control target key end

     0   :  { %s1474_s30 = smov 0   ;;  %s1476_s10 = smov 0   ;;  %s1741_s0 = inlined_call_operand.vmem [shape: f32[2,16,16], index: 0, kind: input, shape index: {}]   ;;  %s1742_s1 = inlined_call_operand.vmem [shape: f32[2,16,16], index: 1, kind: input, shape index: {}]   ;;  %s1743_s2 = inlined_call_operand.vmem [shape: f32[4,16,16], index: 2, kind: input, shape index: {}]   ;;  %s1744_s3 = inlined_call_operand.vmem [shape: f32[4,16,16], index: 3, kind: input, shape index: {}]   ;;  %s1745_s4 = inlined_call_operand.vmem [shape: f32[16,16], index: 4, kind: input, shape index: {}]   ;;  %s1746_s5 = inlined_call_operand.vmem [shape: f32[16,16], index: 5, kind: input, shape index: {}]   ;;  %s1747_s6 = inlined_call_operand.vmem [shape: f32[16,16], index: 6, kind: input, shape index: {}]   ;;  %s1748_s7 = inlined_call_operand.vmem [shape: f32[16,16], index: 7, kind: input, shape index: {}]   ;;  %s1749_s8 = inlined_call_operand.vmem [shape: f32[2,4,16,16], index: 8, kind: output, shape index: {0}]   ;;  %s1750_s9 = inlined_call_operand.vmem [shape: f32[2,4,16,16], index: 9, kind: output, shape index: {1}]  }
   0x1   :  { %s1478_s11 = smov 0  }
   0x2 LB: > { %s32_s12 = sadd.s32 1, %s1418_s10  ;;  %p1301_p0 = scmp.ge.s32.totalorder %s1422_s11, 1  ;;  %s1422_s11 = sphi %s1478_s11, %s20_s11   ;;  %s1418_s10 = sphi %s1476_s10, %s1752_s10   ;;  %s1414_s30 = sphi %s1474_s30, %s1751_s30  }
   0x3   : > { %p34_p1 = scmp.ge.s32.totalorder %s32_s12, 2  ;;  %p340_p2 = scmp.lt.s32.totalorder %s1422_s11, 3 }
   0x5   : > { %s1754_s12 = smov (%p34_p1, %s32_s12), 0  ;;  %p341_p3 = pnand %p1301_p0, %p340_p2 }
   0x6   : > { %p408_p4 = scmp.lt.s32.totalorder (!%p341_p3), %s1414_s30, 1 }
   0x7   : > { %344 = sbr.rel (%p341_p3) target bundleno = 387 (0x183), region = 52 }
   0xc   : > { %v523_v0 = vld [vmem:[%s1747_s6 + $0x8] sm:$0xff]  ;;  %v522_v2 = vld [vmem:[%s1747_s6] sm:$0xff]  ;;  %s1756_s30 = smov (!%p408_p4, %s1414_s30), 1  ;;  %vm528_vm0 = vcmask 130048   ;;  %v460_v27 = vld [vmem:[%s1743_s2 + $0x10] sm:$0xff] }
   0xd   : > { %v525_v1 = vld [vmem:[%s1748_s7 + $0x8] sm:$0xff]  ;;  %567 = vmatpush.msra.mxu0 %v523_v0  ;;  %v524_v3 = vld [vmem:[%s1748_s7] sm:$0xff]  ;;  %s1372_s21 = sshll.u32 %s1756_s30, 4  ;;  %v468_v28 = vld [vmem:[%s1744_s3 + $0x10] sm:$0xff]  ;;  %s1374_s17 = sshll.u32 %s1756_s30, 6 }
   0xe   : > { %632 = vmatpush.msra.mxu1 %v525_v1  ;;  %v527_v4 = vadd.f32 %v525_v1, %v523_v0  ;;  %v526_v5 = vadd.f32 %v524_v3, %v522_v2  ;;  %v458_v6 = vld [vmem:[%s1743_s2] sm:$0xff]  ;;  %s412_s28 = scalar_lea.vmem %s1741_s0, %s1372_s21  ;;  %s417_s14 = scalar_lea.vmem %s1742_s1, %s1372_s21  ;;  %v459_v8 = vld [vmem:[%s1743_s2 + $0x8] sm:$0xff]  ;;  %v461_v36 = vld [vmem:[%s1743_s2 + $0x18] sm:$0xff] }
   0xf   : > { %568 = vmatpush.msra.mxu0 %v522_v2  ;;  %v466_v7 = vld [vmem:[%s1744_s3] sm:$0xff]  ;;  %v467_v9 = vld [vmem:[%s1744_s3 + $0x8] sm:$0xff]  ;;  %v469_v37 = vld [vmem:[%s1744_s3 + $0x18] sm:$0xff]  ;;  %s1693_s20 = scalar_lea.vmem %s1749_s8, %s1374_s17  ;;  %s1702_s30 = scalar_lea.vmem %s1750_s9, %s1374_s17 }
  0x10   : > { %633 = vmatpush.msra.mxu1 %v524_v3  ;;  %705 = vmatpush.msra.mxu2 %v527_v4  ;;  %v1525_v10 = vld [vmem:[%s412_s28] sm:$0xff]  ;;  %v1529_v12 = vld [vmem:[%s412_s28 + $0x8] sm:$0xff]  ;;  %v464_v63 = vld [vmem:[%s1743_s2 + $0x30] sm:$0xff] }
  0x11   : > { %v1527_v11 = vld [vmem:[%s417_s14] sm:$0xff]  ;;  %v474_v13 = vmul.f32 %v458_v6, %v1525_v10  ;;  %v498_v15 = vmul.f32 %v466_v7, %v1525_v10  ;;  %v1535_v17 = vld [vmem:[%s417_s14 + $0x8] sm:$0xff]  ;;  %v475_v18 = vmul.f32 %v459_v8, %v1529_v12  ;;  %v499_v22 = vmul.f32 %v467_v9, %v1529_v12  ;;  %v472_v0 = vld [vmem:[%s1744_s3 + $0x30] sm:$0xff] }
  0x12   : > { %706 = vmatpush.msra.mxu2 %v526_v5  ;;  %v482_v14 = vmul.f32 %v466_v7, %v1527_v11  ;;  %v506_v16 = vmul.f32 %v458_v6, %v1527_v11  ;;  %v483_v19 = vmul.f32 %v467_v9, %v1535_v17  ;;  %v507_v23 = vmul.f32 %v459_v8, %v1535_v17  ;;  %v462_v45 = vld [vmem:[%s1743_s2 + $0x20] sm:$0xff]  ;;  %v463_v54 = vld [vmem:[%s1743_s2 + $0x28] sm:$0xff]  ;;  %v465_v8 = vld [vmem:[%s1743_s2 + $0x38] sm:$0xff] }
  0x13   : > { %v476_v29 = vmul.f32 %v460_v27, %v1525_v10  ;;  %v484_v31 = vmul.f32 %v468_v28, %v1527_v11  ;;  %v500_v32 = vmul.f32 %v468_v28, %v1525_v10  ;;  %v508_v33 = vmul.f32 %v460_v27, %v1527_v11  ;;  %v470_v46 = vld [vmem:[%s1744_s3 + $0x20] sm:$0xff]  ;;  %v471_v55 = vld [vmem:[%s1744_s3 + $0x28] sm:$0xff]  ;;  %v473_v9 = vld [vmem:[%s1744_s3 + $0x38] sm:$0xff] }
  0x14   : > { %v490_v20 = vsub.f32 %v474_v13, %v482_v14  ;;  %v514_v21 = vadd.f32 %v506_v16, %v498_v15  ;;  %v491_v25 = vsub.f32 %v475_v18, %v483_v19  ;;  %v515_v26 = vadd.f32 %v507_v23, %v499_v22 }
  0x15   : > { %v492_v34 = vsub.f32 %v476_v29, %v484_v31  ;;  %v516_v35 = vadd.f32 %v508_v33, %v500_v32  ;;  %v477_v38 = vmul.f32 %v461_v36, %v1529_v12  ;;  %v485_v40 = vmul.f32 %v469_v37, %v1535_v17  ;;  %v1635_v32 = vld [vmem:[%s1745_s4 + $0x8] sm:$0xff] }
  0x16   : > { %1310 = vmatmul.msk.f32.vlgmr.msra.gmra.mxu0 %vm528_vm0, %v490_v20  ;;  %1318 = vmatmul.msk.f32.vlgmr.msra.gmra.mxu1 %vm528_vm0, %v514_v21  ;;  %v659_v24 = vadd.f32 %v514_v21, %v490_v20  ;;  %v660_v30 = vadd.f32 %v515_v26, %v491_v25  ;;  %v501_v41 = vmul.f32 %v469_v37, %v1529_v12 }
  0x17   : > { %v661_v39 = vadd.f32 %v516_v35, %v492_v34  ;;  %v509_v42 = vmul.f32 %v461_v36, %v1535_v17  ;;  %v493_v43 = vsub.f32 %v477_v38, %v485_v40  ;;  %v478_v47 = vmul.f32 %v462_v45, %v1525_v10  ;;  %v1642_v40 = vld [vmem:[%s1746_s5] sm:$0xff] }
  0x18   : > { %1326 = vmatmul.msk.f32.vlgmr.msra.gmra.mxu2 %vm528_vm0, %v659_v24  ;;  %v486_v49 = vmul.f32 %v470_v46, %v1527_v11  ;;  %v502_v50 = vmul.f32 %v470_v46, %v1525_v10  ;;  %v510_v51 = vmul.f32 %v462_v45, %v1527_v11  ;;  %v479_v56 = vmul.f32 %v463_v54, %v1529_v12 }
  0x19   : > { %v517_v44 = vadd.f32 %v509_v42, %v501_v41  ;;  %v487_v58 = vmul.f32 %v471_v55, %v1535_v17  ;;  %v503_v59 = vmul.f32 %v471_v55, %v1529_v12  ;;  %v511_v60 = vmul.f32 %v463_v54, %v1535_v17 }
  0x1a   : > { %v494_v52 = vsub.f32 %v478_v47, %v486_v49  ;;  %v518_v53 = vadd.f32 %v510_v51, %v502_v50  ;;  %v480_v1 = vmul.f32 %v464_v63, %v1525_v10  ;;  %v488_v2 = vmul.f32 %v472_v0, %v1527_v11  ;;  %v1649_v49 = vld [vmem:[%s1746_s5 + $0x8] sm:$0xff] }
  0x1b   : > { %v662_v48 = vadd.f32 %v517_v44, %v493_v43  ;;  %v495_v61 = vsub.f32 %v479_v56, %v487_v58  ;;  %v519_v62 = vadd.f32 %v511_v60, %v503_v59  ;;  %v504_v3 = vmul.f32 %v472_v0, %v1525_v10 }
  0x1c   : > { %v663_v57 = vadd.f32 %v518_v53, %v494_v52  ;;  %v512_v4 = vmul.f32 %v464_v63, %v1527_v11  ;;  %v496_v6 = vsub.f32 %v480_v1, %v488_v2  ;;  %v481_v11 = vmul.f32 %v465_v8, %v1529_v12 }
  0x1d   : > { %v664_v5 = vadd.f32 %v519_v62, %v495_v61  ;;  %v489_v13 = vmul.f32 %v473_v9, %v1535_v17  ;;  %v505_v14 = vmul.f32 %v473_v9, %v1529_v12  ;;  %v513_v15 = vmul.f32 %v465_v8, %v1535_v17 }
  0x1e   : > { %1311 = vmatmul.msk.f32.gmra.mxu0 %vm528_vm0, %v491_v25  ;;  %1319 = vmatmul.msk.f32.gmra.mxu1 %vm528_vm0, %v515_v26  ;;  %v520_v7 = vadd.f32 %v512_v4, %v504_v3  ;;  %v1628_v25 = vld [vmem:[%s1745_s4] sm:$0xff] }
  0x1f   : > { %v497_v16 = vsub.f32 %v481_v11, %v489_v13  ;;  %v521_v18 = vadd.f32 %v513_v15, %v505_v14 }
  0x20   : > { %1327 = vmatmul.msk.f32.gmra.mxu2 %vm528_vm0, %v660_v30  ;;  %v665_v10 = vadd.f32 %v520_v7, %v496_v6 }
  0x21   : > { %v666_v19 = vadd.f32 %v521_v18, %v497_v16 }
  0x26   : > { %1312 = vmatmul.msk.f32.gmra.mxu0 %vm528_vm0, %v492_v34  ;;  %1320 = vmatmul.msk.f32.gmra.mxu1 %vm528_vm0, %v516_v35 }
  0x28   : > { %1328 = vmatmul.msk.f32.gmra.mxu2 %vm528_vm0, %v661_v39 }
  0x2e   : > { %1313 = vmatmul.msk.f32.gmra.mxu0 %vm528_vm0, %v493_v43  ;;  %1321 = vmatmul.msk.f32.gmra.mxu1 %vm528_vm0, %v517_v44 }
  0x30   : > { %1329 = vmatmul.msk.f32.gmra.mxu2 %vm528_vm0, %v662_v48 }
  0x36   : > { %1314 = vmatmul.msk.f32.gmra.mxu0 %vm528_vm0, %v494_v52  ;;  %1322 = vmatmul.msk.f32.gmra.mxu1 %vm528_vm0, %v518_v53 }
  0x38   : > { %1330 = vmatmul.msk.f32.gmra.mxu2 %vm528_vm0, %v663_v57  ;;  %v760_v57 = vadd.f32 %v1642_v40, %v1628_v25 }
  0x3e   : > { %1315 = vmatmul.msk.f32.gmra.mxu0 %vm528_vm0, %v495_v61  ;;  %1323 = vmatmul.msk.f32.gmra.mxu1 %vm528_vm0, %v519_v62  ;;  %v761_v62 = vadd.f32 %v1649_v49, %v1635_v32 }
  0x40   : > { %1331 = vmatmul.msk.f32.gmra.mxu2 %vm528_vm0, %v664_v5 }
  0x46   : > { %1316 = vmatmul.msk.f32.gmra.mxu0 %vm528_vm0, %v496_v6  ;;  %1324 = vmatmul.msk.f32.gmra.mxu1 %vm528_vm0, %v520_v7 }
  0x48   : > { %1332 = vmatmul.msk.f32.gmra.mxu2 %vm528_vm0, %v665_v10 }
  0x4e   : > { %1317 = vmatmul.msk.f32.gmra.mxu0 %vm528_vm0, %v497_v16  ;;  %1325 = vmatmul.msk.f32.gmra.mxu1 %vm528_vm0, %v521_v18 }
  0x50   : > { %1333 = vmatmul.msk.f32.gmra.mxu2 %vm528_vm0, %v666_v19 }
  0x93   : > { %v570_v20 = vpop.f32.mrf.mxu0  ;;  %v635_v21 = vpop.f32.mrf.mxu1 }
  0x94   : > { %v732_v24 = vsub.f32 %v570_v20, %v635_v21 }
  0x9b   : > { %v573_v12 = vpop.f32.mrf.mxu0  ;;  %v638_v22 = vpop.f32.mrf.mxu1 }
  0x9c   : > { %v708_v17 = vpop.f32.mrf.mxu2  ;;  %v733_v23 = vsub.f32 %v573_v12, %v638_v22 }
  0x9d   : > { %v740_v28 = vsub.f32 %v708_v17, %v570_v20 }
  0x9e   : > { %782 = vmatpush.msra.mxu3 %v733_v23 }
  0x9f   : > { %v748_v33 = vsub.f32 %v740_v28, %v635_v21 }
  0xa0   : > { %783 = vmatpush.msra.mxu3 %v732_v24 }
  0xa1   : > { %1334 = vmatmul.msk.f32.vlgmr.msra.gmra.mxu3 %vm528_vm0, %v1628_v25  ;;  %v820_v37 = vadd.f32 %v748_v33, %v732_v24 }
  0xa3   : > { %v576_v26 = vpop.f32.mrf.mxu0  ;;  %v641_v27 = vpop.f32.mrf.mxu1 }
  0xa4   : > { %v711_v29 = vpop.f32.mrf.mxu2  ;;  %v734_v41 = vsub.f32 %v576_v26, %v641_v27 }
  0xa5   : > { %v741_v30 = vsub.f32 %v711_v29, %v573_v12 }
  0xa7   : > { %v749_v31 = vsub.f32 %v741_v30, %v638_v22 }
  0xa9   : > { %811 = vmatpush.msrb.mxu3 %v749_v31  ;;  %v821_v34 = vadd.f32 %v749_v31, %v733_v23 }
  0xaa   : > { %1335 = vmatmul.msk.f32.gmra.mxu3 %vm528_vm0, %v1635_v32 }
  0xab   : > { %812 = vmatpush.msrb.mxu3 %v748_v33  ;;  %v579_v35 = vpop.f32.mrf.mxu0  ;;  %v644_v36 = vpop.f32.mrf.mxu1 }
  0xac   : > { %v714_v38 = vpop.f32.mrf.mxu2  ;;  %v735_v39 = vsub.f32 %v579_v35, %v644_v36 }
  0xad   : > { %842 = vmatpush.msra.mxu3 %v821_v34  ;;  %v742_v42 = vsub.f32 %v714_v38, %v576_v26 }
  0xaf   : > { %843 = vmatpush.msra.mxu3 %v820_v37  ;;  %v750_v47 = vsub.f32 %v742_v42, %v641_v27 }
  0xb1   : > { %v907_v51 = vadd.f32 %v750_v47, %v734_v41 }
  0xb2   : > { %1336 = vmatmul.msk.f32.vlgmr.msrb.gmra.mxu3 %vm528_vm0, %v1642_v40 }
  0xb3   : > { %875 = vmatpush.msrb.mxu3 %v735_v39  ;;  %v582_v43 = vpop.f32.mrf.mxu0  ;;  %v647_v44 = vpop.f32.mrf.mxu1 }
  0xb4   : > { %v717_v45 = vpop.f32.mrf.mxu2  ;;  %v736_v56 = vsub.f32 %v582_v43, %v647_v44 }
  0xb5   : > { %v743_v46 = vsub.f32 %v717_v45, %v579_v35  ;;  %876 = vmatpush.msrb.mxu3 %v734_v41 }
  0xb7   : > { %v751_v48 = vsub.f32 %v743_v46, %v644_v36 }
  0xb9   : > { %898 = vmatpush.msrb.mxu0 %v751_v48  ;;  %v908_v50 = vadd.f32 %v751_v48, %v735_v39 }
  0xba   : > { %1337 = vmatmul.msk.f32.gmra.mxu3 %vm528_vm0, %v1649_v49 }
  0xbb   : > { %899 = vmatpush.msrb.mxu0 %v750_v47  ;;  %923 = vmatpush.msrb.mxu1 %v908_v50  ;;  %v585_v52 = vpop.f32.mrf.mxu0  ;;  %v650_v53 = vpop.f32.mrf.mxu1 }
  0xbc   : > { %v720_v54 = vpop.f32.mrf.mxu2  ;;  %v737_v55 = vsub.f32 %v585_v52, %v650_v53  ;;  %1342 = vmatmul.msk.f32.vlgmr.msrb.gmra.mxu0 %vm528_vm0, %v1642_v40 }
  0xbd   : > { %924 = vmatpush.msrb.mxu1 %v907_v51  ;;  %v744_v58 = vsub.f32 %v720_v54, %v582_v43 }
  0xbe   : > { %958 = vmatpush.msrb.mxu2 %v737_v55  ;;  %1344 = vmatmul.msk.f32.vlgmr.msrb.gmra.mxu1 %vm528_vm0, %v760_v57 }
  0xbf   : > { %v752_v63 = vsub.f32 %v744_v58, %v647_v44 }
  0xc0   : > { %959 = vmatpush.msrb.mxu2 %v736_v56 }
  0xc1   : > { %1350 = vmatmul.msk.f32.vlgmr.msrb.gmra.mxu2 %vm528_vm0, %v1628_v25  ;;  %v990_v2 = vadd.f32 %v752_v63, %v736_v56 }
  0xc2   : > { %1338 = vmatmul.msk.f32.vlgmr.msra.gmra.mxu3 %vm528_vm0, %v760_v57 }
  0xc3   : > { %v588_v59 = vpop.f32.mrf.mxu0  ;;  %v653_v60 = vpop.f32.mrf.mxu1 }
  0xc4   : > { %v723_v61 = vpop.f32.mrf.mxu2  ;;  %1343 = vmatmul.msk.f32.gmra.mxu0 %vm528_vm0, %v1649_v49  ;;  %v738_v7 = vsub.f32 %v588_v59, %v653_v60 }
  0xc5   : > { %v745_v0 = vsub.f32 %v723_v61, %v585_v52 }
  0xc6   : > { %1345 = vmatmul.msk.f32.gmra.mxu1 %vm528_vm0, %v761_v62 }
  0xc7   : > { %v753_v1 = vsub.f32 %v745_v0, %v650_v53 }
  0xc9   : > { %v991_v3 = vadd.f32 %v753_v1, %v737_v55  ;;  %981 = vmatpush.msra.mxu3 %v753_v1  ;;  %1351 = vmatmul.msk.f32.gmra.mxu2 %vm528_vm0, %v1635_v32 }
  0xca   : > { %1339 = vmatmul.msk.f32.gmra.mxu3 %vm528_vm0, %v761_v62 }
  0xcb   : > { %982 = vmatpush.msra.mxu3 %v752_v63  ;;  %1006 = vmatpush.msra.mxu0 %v991_v3  ;;  %v591_v4 = vpop.f32.mrf.mxu0  ;;  %v656_v5 = vpop.f32.mrf.mxu1 }
  0xcc   : > { %v726_v6 = vpop.f32.mrf.mxu2  ;;  %v739_v8 = vsub.f32 %v591_v4, %v656_v5 }
  0xcd   : > { %1007 = vmatpush.msra.mxu0 %v990_v2  ;;  %v746_v9 = vsub.f32 %v726_v6, %v588_v59 }
  0xce   : > { %1041 = vmatpush.msra.mxu1 %v739_v8  ;;  %1354 = vmatmul.msk.f32.vlgmr.msra.gmra.mxu0 %vm528_vm0, %v760_v57 }
  0xcf   : > { %v754_v11 = vsub.f32 %v746_v9, %v653_v60 }
  0xd0   : > { %1042 = vmatpush.msra.mxu1 %v738_v7 }
  0xd1   : > { %1360 = vmatmul.msk.f32.vlgmr.msra.gmra.mxu1 %vm528_vm0, %v1628_v25  ;;  %v1073_v15 = vadd.f32 %v754_v11, %v738_v7 }
  0xd2   : > { %1340 = vmatmul.msk.f32.vlgmr.msrb.gmra.mxu3 %vm528_vm0, %v1628_v25 }
  0xd4   : > { %v729_v10 = vpop.f32.mrf.mxu2 }
  0xd5   : > { %v747_v13 = vsub.f32 %v729_v10, %v591_v4 }
  0xd6   : > { %1355 = vmatmul.msk.f32.gmra.mxu0 %vm528_vm0, %v761_v62 }
  0xd7   : > { %v755_v14 = vsub.f32 %v747_v13, %v656_v5 }
  0xd9   : > { %v1074_v16 = vadd.f32 %v755_v14, %v739_v8  ;;  %1064 = vmatpush.msra.mxu2 %v755_v14  ;;  %1361 = vmatmul.msk.f32.gmra.mxu1 %vm528_vm0, %v1635_v32 }
  0xda   : > { %1341 = vmatmul.msk.f32.gmra.mxu3 %vm528_vm0, %v1635_v32 }
  0xdb   : > { %1089 = vmatpush.msrb.mxu3 %v1074_v16  ;;  %1065 = vmatpush.msra.mxu2 %v754_v11 }
  0xdc   : > { %1362 = vmatmul.msk.f32.vlgmr.msra.gmra.mxu2 %vm528_vm0, %v1642_v40 }
  0xdd   : > { %1090 = vmatpush.msrb.mxu3 %v1073_v15 }
  0xe2   : > { %1352 = vmatmul.msk.f32.vlgmr.msra.gmra.mxu3 %vm528_vm0, %v1642_v40 }
  0xe4   : > { %1363 = vmatmul.msk.f32.gmra.mxu2 %vm528_vm0, %v1649_v49 }
  0xea   : > { %1353 = vmatmul.msk.f32.gmra.mxu3 %vm528_vm0, %v1649_v49 }
  0xf2   : > { %1364 = vmatmul.msk.f32.vlgmr.msrb.gmra.mxu3 %vm528_vm0, %v760_v57 }
  0xfa   : > { %1365 = vmatmul.msk.f32.gmra.mxu3 %vm528_vm0, %v761_v62 }
 0x124   : > { %v785_v18 = vpop.f32.mrf.mxu3 }
 0x12d   : > { %v788_v19 = vpop.f32.mrf.mxu3 }
 0x135   : > { %v814_v20 = vpop.f32.mrf.mxu3 }
 0x136   : > { %v851_v21 = vsub.f32 %v785_v18, %v814_v20 }
 0x138   : > { %853 = vst.msk [vmem:[%s1693_s20] sm:$0xff] %vm528_vm0, %v851_v21 }
 0x139   : > { %v901_v25 = vpop.f32.mrf.mxu0 }
 0x13b   : > { %v926_v26 = vpop.f32.mrf.mxu1 }
 0x13d   : > { %v817_v12 = vpop.f32.mrf.mxu3 }
 0x13e   : > { %v852_v22 = vsub.f32 %v788_v19, %v817_v12 }
 0x140   : > { %854 = vst.msk [vmem:[%s1693_s20 + $0x8] sm:$0xff] %vm528_vm0, %v852_v22 }
 0x141   : > { %v904_v31 = vpop.f32.mrf.mxu0 }
 0x143   : > { %v929_v32 = vpop.f32.mrf.mxu1 }
 0x144   : > { %v961_v28 = vpop.f32.mrf.mxu2 }
 0x145   : > { %v845_v17 = vpop.f32.mrf.mxu3 }
 0x146   : > { %v855_v23 = vsub.f32 %v845_v17, %v785_v18 }
 0x148   : > { %v857_v24 = vsub.f32 %v855_v23, %v814_v20 }
 0x14a   : > { %859 = vst.msk [vmem:[%s1702_s30] sm:$0xff] %vm528_vm0, %v857_v24 }
 0x14b   : > { %v1009_v40 = vpop.f32.mrf.mxu0 }
 0x14c   : > { %v964_v36 = vpop.f32.mrf.mxu2  ;;  %v1020_v46 = vsub.f32 %v1009_v40, %v961_v28 }
 0x14d   : > { %v848_v27 = vpop.f32.mrf.mxu3 }
 0x14e   : > { %v856_v29 = vsub.f32 %v848_v27, %v788_v19  ;;  %v1044_v38 = vpop.f32.mrf.mxu1 }
 0x150   : > { %v858_v30 = vsub.f32 %v856_v29, %v817_v12 }
 0x152   : > { %860 = vst.msk [vmem:[%s1702_s30 + $0x8] sm:$0xff] %vm528_vm0, %v858_v30 }
 0x153   : > { %v1012_v51 = vpop.f32.mrf.mxu0 }
 0x154   : > { %v1021_v54 = vsub.f32 %v1012_v51, %v964_v36 }
 0x155   : > { %v878_v33 = vpop.f32.mrf.mxu3 }
 0x156   : > { %v932_v34 = vsub.f32 %v878_v33, %v901_v25  ;;  %v937_v35 = vsub.f32 %v926_v26, %v878_v33  ;;  %v1047_v48 = vpop.f32.mrf.mxu1 }
 0x158   : > { %1346 = vst.msk [vmem:[%s1693_s20 + $0x10] sm:$0xff] %vm528_vm0, %v932_v34  ;;  %v939_v37 = vsub.f32 %v937_v35, %v901_v25 }
 0x15a   : > { %1348 = vst.msk [vmem:[%s1702_s30 + $0x10] sm:$0xff] %vm528_vm0, %v939_v37 }
 0x15d   : > { %v881_v39 = vpop.f32.mrf.mxu3 }
 0x15e   : > { %v933_v41 = vsub.f32 %v881_v39, %v904_v31  ;;  %v938_v42 = vsub.f32 %v929_v32, %v881_v39 }
 0x15f   : > { %v1067_v43 = vpop.f32.mrf.mxu2 }
 0x160   : > { %1347 = vst.msk [vmem:[%s1693_s20 + $0x18] sm:$0xff] %vm528_vm0, %v933_v41  ;;  %v940_v44 = vsub.f32 %v938_v42, %v904_v31  ;;  %v1098_v45 = vsub.f32 %v1044_v38, %v1067_v43 }
 0x162   : > { %1349 = vst.msk [vmem:[%s1702_s30 + $0x18] sm:$0xff] %vm528_vm0, %v940_v44 }
 0x163   : > { %1366 = vst.msk [vmem:[%s1693_s20 + $0x30] sm:$0xff] %vm528_vm0, %v1098_v45 }
 0x165   : > { %v984_v47 = vpop.f32.mrf.mxu3 }
 0x166   : > { %v1015_v49 = vsub.f32 %v961_v28, %v984_v47  ;;  %v1022_v50 = vsub.f32 %v1020_v46, %v984_v47 }
 0x167   : > { %v1070_v52 = vpop.f32.mrf.mxu2 }
 0x168   : > { %1356 = vst.msk [vmem:[%s1693_s20 + $0x20] sm:$0xff] %vm528_vm0, %v1015_v49  ;;  %v1099_v53 = vsub.f32 %v1047_v48, %v1070_v52 }
 0x169   : > { %1358 = vst.msk [vmem:[%s1702_s30 + $0x20] sm:$0xff] %vm528_vm0, %v1022_v50 }
 0x16a   : > { %1367 = vst.msk [vmem:[%s1693_s20 + $0x38] sm:$0xff] %vm528_vm0, %v1099_v53 }
 0x16d   : > { %v987_v55 = vpop.f32.mrf.mxu3 }
 0x16e   : > { %v1016_v56 = vsub.f32 %v964_v36, %v987_v55  ;;  %v1023_v57 = vsub.f32 %v1021_v54, %v987_v55 }
 0x170   : > { %1357 = vst.msk [vmem:[%s1693_s20 + $0x28] sm:$0xff] %vm528_vm0, %v1016_v56 }
 0x171   : > { %1359 = vst.msk [vmem:[%s1702_s30 + $0x28] sm:$0xff] %vm528_vm0, %v1023_v57 }
 0x175   : > { %v1092_v58 = vpop.f32.mrf.mxu3 }
 0x176   : > { %v1103_v59 = vsub.f32 %v1092_v58, %v1044_v38 }
 0x178   : > { %v1105_v60 = vsub.f32 %v1103_v59, %v1067_v43 }
 0x17a   : > { %1368 = vst.msk [vmem:[%s1702_s30 + $0x30] sm:$0xff] %vm528_vm0, %v1105_v60 }
 0x17d   : > { %v1095_v61 = vpop.f32.mrf.mxu3 }
 0x17e   : > { %v1104_v62 = vsub.f32 %v1095_v61, %v1047_v48 }
 0x180   : > { %v1106_v63 = vsub.f32 %v1104_v62, %v1070_v52 }
 0x182   : > { %1369 = vst.msk [vmem:[%s1702_s30 + $0x38] sm:$0xff] %vm528_vm0, %v1106_v63 }
 0x183 PF: > { %s20_s11 = sadd.s32 1, %s1422_s11   ;;  %s1751_s30 = smov %s1418_s10 }
 0x184   : > { %p17_p5 = scmp.ge.s32.totalorder %s20_s11, 4   ;;  %s1752_s10 = smov %s1754_s12 }
 0x186   :  { %19 = sbr.rel (!%p17_p5) target bundleno = 2 (0x2), region = 109 }

</bundles_post_ra>
